<compile_context>
chip_gen: v6e
topology: v6e:2x2x1
jax: 0.10.0
libtpu: 0.0.40
codegen_flags: <defaults>
</compile_context>

<pallas_src>
import math

import jax
import jax.numpy as jnp
from jax import lax
from jax.experimental import pallas as pl
from jax.experimental.pallas import tpu as pltpu

B, T, D = 2, 8, 32          # batch, sequence length, model size
BT = B * T                  # batch folded into the token/row axis
H = 4                       # attention heads
DK = D // H                 # per-head dim
DFF = 64                    # feed-forward hidden size
EPS = 1e-5                  # torch.nn.LayerNorm default eps
NEG = -1e9                  # masked_fill value in scaled-dot-product attention
SCALE = 1.0 / math.sqrt(DK)


# ----------------------------- kernel helpers -------------------------------
def _layer_norm(v, g, b):
    mu = jnp.mean(v, axis=-1, keepdims=True)
    var = jnp.mean((v - mu) ** 2, axis=-1, keepdims=True)
    return (v - mu) * lax.rsqrt(var + EPS) * g + b


def _softmax(s):
    m = jnp.max(s, axis=-1, keepdims=True)
    e = jnp.exp(s - m)
    return e * pl.reciprocal(jnp.sum(e, axis=-1, keepdims=True), approx=True)


def _swap_minor(a3):
    """(H, DK, BT) -> (H, BT, DK) using only 2-D transposes (safe lowering)."""
    return jnp.stack([a3[h].T for h in range(H)], axis=0)


def _attend(qh, k3, v3, neg):
    """Attention batched over heads (batch already folded into the token axis).

    qh : (H, BT, DK)  per-head queries (token-major)
    k3 : (H, DK, BT)  per-head keys   (feature-major)
    v3 : (H, DK, BT)  per-head values (feature-major)
    neg: (BT, BT)     additive mask (0 / -1e9): causal + cross-batch blocks
    returns ctx (BT, D) with heads concatenated along features.
    """
    s = jnp.einsum("hqd,hdk->hqk", qh, k3,
                   preferred_element_type=jnp.float32)        # (H, BT, BT)
    p = _softmax(s * SCALE + neg)
    ctx_t = jnp.einsum("hdk,hqk->hdq", v3, p,
                       preferred_element_type=jnp.float32)     # (H, DK, BT)
    return ctx_t.reshape(D, BT).T                              # (BT, D)


# --------------------------------- kernel -----------------------------------
def decoder_layer_kernel(x_ref, q_ref, neg_ref,
                         wqkvt_s_ref, bqkvt_s_ref,
                         wqt_c_ref, bqt_c_ref, wkvt_c_ref, bkvt_c_ref,
                         wo_ref, bo_ref, lng_ref, lnb_ref,
                         w1_ref, c1_ref, w2_ref, c2_ref,
                         o_ref):
    x = x_ref[...]                      # (BT, D) f32
    neg = neg_ref[...]                  # (BT, BT) additive mask

    # ---- sublayer[0]: x + self_attn(LN(x), LN(x), LN(x), mask) ----
    # TODO(synk): dropout is identity (eval mode); no RNG applied.
    xn = _layer_norm(x, lng_ref[0], lnb_ref[0])
    qkv_t = jnp.dot(wqkvt_s_ref[...], xn.T,
                    preferred_element_type=jnp.float32) + bqkvt_s_ref[...]  # (3D, BT)
    qkv = qkv_t.reshape(3, H, DK, BT)
    ctx = _attend(_swap_minor(qkv[0]), qkv[1], qkv[2], neg)
    x = x + jnp.dot(ctx, wo_ref[0], preferred_element_type=jnp.float32) + bo_ref[0]

    # ---- x + cross_attn(q, x, x, mask)   (q and x enter un-normalized) ----
    q_t = jnp.dot(wqt_c_ref[...], q_ref[...].T,
                  preferred_element_type=jnp.float32) + bqt_c_ref[...]      # (D, BT)
    kv_t = jnp.dot(wkvt_c_ref[...], x.T,
                   preferred_element_type=jnp.float32) + bkvt_c_ref[...]    # (2D, BT)
    kv = kv_t.reshape(2, H, DK, BT)
    ctx = _attend(_swap_minor(q_t.reshape(H, DK, BT)), kv[0], kv[1], neg)
    x = x + jnp.dot(ctx, wo_ref[1], preferred_element_type=jnp.float32) + bo_ref[1]

    # ---- standalone LayerNorm ----
    x = _layer_norm(x, lng_ref[1], lnb_ref[1])

    # ---- sublayer[1]: x + feed_forward(LN(x)) ----
    xn2 = _layer_norm(x, lng_ref[2], lnb_ref[2])
    hid = jnp.maximum(
        jnp.dot(xn2, w1_ref[...], preferred_element_type=jnp.float32) + c1_ref[...],
        0.0)
    x = x + jnp.dot(hid, w2_ref[...], preferred_element_type=jnp.float32) + c2_ref[...]

    o_ref[...] = x


# ------------------------ one-time parameter packing ------------------------
def pack_params(params):
    """Pack the 26 module parameters into 14 kernel buffers, ONCE at init.

    Projection weights are stored transposed so the in-kernel head split needs
    only sublane-aligned reshapes (no lane slicing).  Everything stays f32.
    """
    (swq, sbq, swk, sbk, swv, sbv, swo, sbo,
     cwq, cbq, cwk, cbk, cwv, cbv, cwo, cbo,
     g0, b0, gln, bln, g1, b1,
     w1, c1, w2, c2) = params

    wqkvt_s = jnp.concatenate([swq.T, swk.T, swv.T], axis=0)            # (3D, D)
    bqkvt_s = jnp.concatenate([sbq, sbk, sbv], axis=1).reshape(3 * D, 1)
    wqt_c = cwq.T                                                        # (D, D)
    bqt_c = cbq.reshape(D, 1)
    wkvt_c = jnp.concatenate([cwk.T, cwv.T], axis=0)                     # (2D, D)
    bkvt_c = jnp.concatenate([cbk, cbv], axis=1).reshape(2 * D, 1)
    wo = jnp.stack([swo, cwo])                                           # (2, D, D)
    bo = jnp.stack([sbo, cbo])                                           # (2, 1, D)
    lng = jnp.stack([g0, gln, g1])                                       # (3, 1, D)
    lnb = jnp.stack([b0, bln, b1])                                       # (3, 1, D)
    return (wqkvt_s, bqkvt_s, wqt_c, bqt_c, wkvt_c, bkvt_c,
            wo, bo, lng, lnb, w1, c1, w2, c2)


# -------------------------------- wrapper ------------------------------------
def decoder_layer(x, q, mask, packed):
    Bv, Tv, Dv = x.shape
    bt = Bv * Tv
    x2 = x.reshape(bt, Dv)
    q2 = q.reshape(bt, Dv)

    # Precomputed additive mask (review item): 0 where attention is allowed,
    # -1e9 elsewhere.  Cross-batch (block-off-diagonal) pairs are masked so the
    # kernel can process the whole folded (bt, bt) score matrix per head.
    rb = jnp.arange(bt) // Tv
    rt = jnp.arange(bt) % Tv
    allowed = (rb[:, None] == rb[None, :]) & \
              (mask[rb[:, None], rt[:, None], rt[None, :]] != 0)
    neg = jnp.where(allowed, 0.0, NEG).astype(jnp.float32)              # (bt, bt)

    inputs = [x2, q2, neg, *packed]

    flops = int(2 * bt * Dv * (3 * Dv)              # self-attn fused QKV
                + 2 * bt * Dv * (3 * Dv)            # cross-attn Q + KV
                + 2 * 2 * (2 * H * bt * bt * DK)    # scores + ctx, both attns
                + 2 * (2 * bt * Dv * Dv)            # two output projections
                + 2 * 2 * bt * Dv * DFF)            # feed-forward
    transcendentals = int(2 * H * bt * bt + 3 * bt)
    bytes_accessed = int(sum(a.size * a.dtype.itemsize for a in inputs)
                         + bt * Dv * 4)

    out = pl.pallas_call(
        decoder_layer_kernel,
        out_shape=jax.ShapeDtypeStruct((bt, Dv), jnp.float32),
        in_specs=[pl.BlockSpec(memory_space=pltpu.MemorySpace.VMEM)
                  for _ in inputs],
        out_specs=pl.BlockSpec(memory_space=pltpu.MemorySpace.VMEM),
        cost_estimate=pl.CostEstimate(flops=flops,
                                      transcendentals=transcendentals,
                                      bytes_accessed=bytes_accessed),
    )(*inputs)
    return out.reshape(Bv, Tv, Dv)


# -------------------------- deterministic params -----------------------------
def init_params(key):
    ks = jax.random.split(key, 10)

    def lin(k, din, dout):
        k1, k2 = jax.random.split(k)
        w = jax.random.normal(k1, (din, dout), jnp.float32) * 0.05
        b = jax.random.normal(k2, (1, dout), jnp.float32) * 0.05
        return [w, b]

    params = []
    for i in range(4):                       # self-attn q, k, v, out
        params += lin(ks[i], D, D)
    for i in range(4):                       # cross-attn q, k, v, out
        params += lin(ks[4 + i], D, D)
    for _ in range(3):                       # 3 LayerNorms (gamma=1, beta=0)
        params += [jnp.ones((1, D), jnp.float32), jnp.zeros((1, D), jnp.float32)]
    params += lin(ks[8], D, DFF)             # FFN w1
    params += lin(ks[9], DFF, D)             # FFN w2
    return params


# ----------------------------- pure-JAX reference ----------------------------
def ref_layer_norm(v, g, b):
    mu = v.mean(-1, keepdims=True)
    var = ((v - mu) ** 2).mean(-1, keepdims=True)
    return (v - mu) / jnp.sqrt(var + EPS) * g + b


def ref_mha(query, key, value, mask, wq, bq, wk, bk, wv, bv, wo, bo):
    Tq = query.shape[0]
    Q = (query @ wq + bq).reshape(Tq, H, DK).transpose(1, 0, 2)
    K = (key @ wk + bk).reshape(-1, H, DK).transpose(1, 0, 2)
    V = (value @ wv + bv).reshape(-1, H, DK).transpose(1, 0, 2)
    s = jnp.einsum("htd,hsd->hts", Q, K) / (DK ** 0.5)
    s = jnp.where(mask[None] == 0, NEG, s)
    p = jax.nn.softmax(s, axis=-1)
    ctx = jnp.einsum("hts,hsd->htd", p, V).transpose(1, 0, 2).reshape(Tq, D)
    return ctx @ wo + bo


def ref_decoder_layer(x, q, mask, params):
    (swq, sbq, swk, sbk, swv, sbv, swo, sbo,
     cwq, cbq, cwk, cbk, cwv, cbv, cwo, cbo,
     g0, b0, gln, bln, g1, b1,
     w1, c1, w2, c2) = params

    def one(xb, qb, mb):
        xn = ref_layer_norm(xb, g0, b0)
        xb = xb + ref_mha(xn, xn, xn, mb,
                          swq, sbq, swk, sbk, swv, sbv, swo, sbo)
        xb = xb + ref_mha(qb, xb, xb, mb,
                          cwq, cbq, cwk, cbk, cwv, cbv, cwo, cbo)
        xb = ref_layer_norm(xb, gln, bln)
        xn2 = ref_layer_norm(xb, g1, b1)
        return xb + jnp.maximum(xn2 @ w1 + c1, 0.0) @ w2 + c2

    return jax.vmap(one)(x, q, mask)


# ---------------------------------- main --------------------------------------
if __name__ == "__main__":
    key = jax.random.PRNGKey(0)
    kx, kq, kp = jax.random.split(key, 3)
    x = jax.random.normal(kx, (B, T, D), jnp.float32)
    q = jax.random.normal(kq, (B, T, D), jnp.float32)
    mask = jnp.broadcast_to(jnp.tril(jnp.ones((T, T), jnp.float32)), (B, T, T))
    params = init_params(kp)

    # Pack once, outside the per-call path (perf review item #1).
    packed = jax.block_until_ready(pack_params(params))

    apply_fn = jax.jit(decoder_layer)
    out = jax.block_until_ready(apply_fn(x, q, mask, packed))

    ref = ref_decoder_layer(x, q, mask, params)
    err = float(jnp.max(jnp.abs(out - ref)))
    # f32 matmuls everywhere; only the approx softmax reciprocal is inexact.
    assert jnp.allclose(out, ref, atol=2e-2, rtol=2e-2), err
    print("KERNEL_OK")
</pallas_src>

<mosaic_0001>
module attributes {stable_mosaic.version = 11 : i64} {
  func.func @decoder_layer_kernel(%arg0: memref<16x32xf32, #tpu.memory_space<vmem>>, %arg1: memref<16x32xf32, #tpu.memory_space<vmem>>, %arg2: memref<16x16xf32, #tpu.memory_space<vmem>>, %arg3: memref<96x32xf32, #tpu.memory_space<vmem>>, %arg4: memref<96x1xf32, #tpu.memory_space<vmem>>, %arg5: memref<32x32xf32, #tpu.memory_space<vmem>>, %arg6: memref<32x1xf32, #tpu.memory_space<vmem>>, %arg7: memref<64x32xf32, #tpu.memory_space<vmem>>, %arg8: memref<64x1xf32, #tpu.memory_space<vmem>>, %arg9: memref<2x32x32xf32, #tpu.memory_space<vmem>>, %arg10: memref<2x1x32xf32, #tpu.memory_space<vmem>>, %arg11: memref<3x1x32xf32, #tpu.memory_space<vmem>>, %arg12: memref<3x1x32xf32, #tpu.memory_space<vmem>>, %arg13: memref<32x64xf32, #tpu.memory_space<vmem>>, %arg14: memref<1x64xf32, #tpu.memory_space<vmem>>, %arg15: memref<64x32xf32, #tpu.memory_space<vmem>>, %arg16: memref<1x32xf32, #tpu.memory_space<vmem>>, %arg17: memref<16x32xf32, #tpu.memory_space<vmem>>) attributes {dimension_semantics = [], scalar_prefetch = 0 : i64, scratch_operands = 0 : i64, tpu.core_type = #tpu.core_type<tc>} {
    %c0 = arith.constant 0 : index
    %c0_0 = arith.constant 0 : index
    %0 = vector.load %arg0[%c0, %c0_0] : memref<16x32xf32, #tpu.memory_space<vmem>>, vector<16x32xf32>
    %c0_1 = arith.constant 0 : index
    %c0_2 = arith.constant 0 : index
    %1 = vector.load %arg2[%c0_1, %c0_2] : memref<16x16xf32, #tpu.memory_space<vmem>>, vector<16x16xf32>
    %c0_3 = arith.constant 0 : index
    %c0_4 = arith.constant 0 : index
    %c0_5 = arith.constant 0 : index
    %2 = vector.load %arg11[%c0_3, %c0_4, %c0_5] : memref<3x1x32xf32, #tpu.memory_space<vmem>>, vector<1x1x32xf32>
    %3 = vector.shape_cast %2 : vector<1x1x32xf32> to vector<1x32xf32>
    %c0_6 = arith.constant 0 : index
    %c0_7 = arith.constant 0 : index
    %c0_8 = arith.constant 0 : index
    %4 = vector.load %arg12[%c0_6, %c0_7, %c0_8] : memref<3x1x32xf32, #tpu.memory_space<vmem>>, vector<1x1x32xf32>
    %5 = vector.shape_cast %4 : vector<1x1x32xf32> to vector<1x32xf32>
    %cst = arith.constant dense<0.000000e+00> : vector<16xf32>
    %6 = vector.multi_reduction <add>, %0, %cst [1] : vector<16x32xf32> to vector<16xf32>
    %7 = vector.shape_cast %6 : vector<16xf32> to vector<16x1xf32>
    %cst_9 = arith.constant 3.200000e+01 : f32
    %8 = vector.broadcast %cst_9 : f32 to vector<16x1xf32>
    %9 = arith.divf %7, %8 : vector<16x1xf32>
    %10 = vector.broadcast %9 : vector<16x1xf32> to vector<16x32xf32>
    %11 = arith.subf %0, %10 : vector<16x32xf32>
    %12 = arith.mulf %11, %11 : vector<16x32xf32>
    %cst_10 = arith.constant dense<0.000000e+00> : vector<16xf32>
    %13 = vector.multi_reduction <add>, %12, %cst_10 [1] : vector<16x32xf32> to vector<16xf32>
    %14 = vector.shape_cast %13 : vector<16xf32> to vector<16x1xf32>
    %cst_11 = arith.constant 3.200000e+01 : f32
    %15 = vector.broadcast %cst_11 : f32 to vector<16x1xf32>
    %16 = arith.divf %14, %15 : vector<16x1xf32>
    %17 = vector.broadcast %9 : vector<16x1xf32> to vector<16x32xf32>
    %18 = arith.subf %0, %17 : vector<16x32xf32>
    %cst_12 = arith.constant 9.99999974E-6 : f32
    %19 = vector.broadcast %cst_12 : f32 to vector<16x1xf32>
    %20 = arith.addf %16, %19 : vector<16x1xf32>
    %21 = math.rsqrt %20 : vector<16x1xf32>
    %22 = vector.broadcast %21 : vector<16x1xf32> to vector<16x32xf32>
    %23 = arith.mulf %18, %22 : vector<16x32xf32>
    %24 = vector.broadcast %3 : vector<1x32xf32> to vector<16x32xf32>
    %25 = arith.mulf %23, %24 : vector<16x32xf32>
    %26 = vector.broadcast %5 : vector<1x32xf32> to vector<16x32xf32>
    %27 = arith.addf %25, %26 : vector<16x32xf32>
    %c0_13 = arith.constant 0 : index
    %c0_14 = arith.constant 0 : index
    %28 = vector.load %arg3[%c0_13, %c0_14] : memref<96x32xf32, #tpu.memory_space<vmem>>, vector<96x32xf32>
    %29 = tpu.transpose %27, [1, 0] : vector<16x32xf32> -> vector<32x16xf32>
    %cst_15 = arith.constant dense<0.000000e+00> : vector<96x16xf32>
    %30 = tpu.matmul %28, %29, %cst_15 {dimension_numbers = #tpu.dot_dimension_numbers<[1], [0], [0], [1], [0, 0, 1, 1], [], []>} : vector<96x32xf32>, vector<32x16xf32>, vector<96x16xf32> -> vector<96x16xf32>
    %c0_16 = arith.constant 0 : index
    %c0_17 = arith.constant 0 : index
    %31 = vector.load %arg4[%c0_16, %c0_17] : memref<96x1xf32, #tpu.memory_space<vmem>>, vector<96x1xf32>
    %32 = vector.broadcast %31 : vector<96x1xf32> to vector<96x16xf32>
    %33 = arith.addf %30, %32 : vector<96x16xf32>
    %34 = vector.shape_cast %33 : vector<96x16xf32> to vector<3x4x8x16xf32>
    %35 = vector.extract_strided_slice %34 {offsets = [0, 0, 0, 0], sizes = [1, 4, 8, 16], strides = [1, 1, 1, 1]} : vector<3x4x8x16xf32> to vector<1x4x8x16xf32>
    %36 = vector.shape_cast %35 : vector<1x4x8x16xf32> to vector<4x8x16xf32>
    %37 = vector.extract_strided_slice %36 {offsets = [0, 0, 0], sizes = [1, 8, 16], strides = [1, 1, 1]} : vector<4x8x16xf32> to vector<1x8x16xf32>
    %38 = vector.shape_cast %37 : vector<1x8x16xf32> to vector<8x16xf32>
    %39 = tpu.transpose %38, [1, 0] : vector<8x16xf32> -> vector<16x8xf32>
    %40 = vector.extract_strided_slice %36 {offsets = [1, 0, 0], sizes = [1, 8, 16], strides = [1, 1, 1]} : vector<4x8x16xf32> to vector<1x8x16xf32>
    %41 = vector.shape_cast %40 : vector<1x8x16xf32> to vector<8x16xf32>
    %42 = tpu.transpose %41, [1, 0] : vector<8x16xf32> -> vector<16x8xf32>
    %43 = vector.extract_strided_slice %36 {offsets = [2, 0, 0], sizes = [1, 8, 16], strides = [1, 1, 1]} : vector<4x8x16xf32> to vector<1x8x16xf32>
    %44 = vector.shape_cast %43 : vector<1x8x16xf32> to vector<8x16xf32>
    %45 = tpu.transpose %44, [1, 0] : vector<8x16xf32> -> vector<16x8xf32>
    %46 = vector.extract_strided_slice %36 {offsets = [3, 0, 0], sizes = [1, 8, 16], strides = [1, 1, 1]} : vector<4x8x16xf32> to vector<1x8x16xf32>
    %47 = vector.shape_cast %46 : vector<1x8x16xf32> to vector<8x16xf32>
    %48 = tpu.transpose %47, [1, 0] : vector<8x16xf32> -> vector<16x8xf32>
    %49 = vector.shape_cast %39 : vector<16x8xf32> to vector<1x16x8xf32>
    %50 = vector.shape_cast %42 : vector<16x8xf32> to vector<1x16x8xf32>
    %51 = vector.shape_cast %45 : vector<16x8xf32> to vector<1x16x8xf32>
    %52 = vector.shape_cast %48 : vector<16x8xf32> to vector<1x16x8xf32>
    %53 = tpu.concatenate %49, %50, %51, %52 in 0 : vector<1x16x8xf32>, vector<1x16x8xf32>, vector<1x16x8xf32>, vector<1x16x8xf32> -> vector<4x16x8xf32>
    %54 = vector.extract_strided_slice %34 {offsets = [1, 0, 0, 0], sizes = [1, 4, 8, 16], strides = [1, 1, 1, 1]} : vector<3x4x8x16xf32> to vector<1x4x8x16xf32>
    %55 = vector.shape_cast %54 : vector<1x4x8x16xf32> to vector<4x8x16xf32>
    %56 = vector.extract_strided_slice %34 {offsets = [2, 0, 0, 0], sizes = [1, 4, 8, 16], strides = [1, 1, 1, 1]} : vector<3x4x8x16xf32> to vector<1x4x8x16xf32>
    %57 = vector.shape_cast %56 : vector<1x4x8x16xf32> to vector<4x8x16xf32>
    "tpu.trace_start"() <{level = 10 : i32, message = "hqd,hdk->hqk"}> : () -> ()
    %cst_18 = arith.constant dense<0.000000e+00> : vector<4x16x16xf32>
    %58 = tpu.matmul %53, %55, %cst_18 {dimension_numbers = #tpu.dot_dimension_numbers<[2], [1], [1], [2], [0, 0, 0, 1, 1, 2], [0], [0]>} : vector<4x16x8xf32>, vector<4x8x16xf32>, vector<4x16x16xf32> -> vector<4x16x16xf32>
    "tpu.trace_stop"() : () -> ()
    %cst_19 = arith.constant 0.353553385 : f32
    %59 = vector.broadcast %cst_19 : f32 to vector<4x16x16xf32>
    %60 = arith.mulf %58, %59 : vector<4x16x16xf32>
    %61 = vector.shape_cast %1 : vector<16x16xf32> to vector<1x16x16xf32>
    %62 = vector.broadcast %61 : vector<1x16x16xf32> to vector<4x16x16xf32>
    %63 = arith.addf %60, %62 : vector<4x16x16xf32>
    %cst_20 = arith.constant dense<0xFF800000> : vector<4x16xf32>
    %64 = vector.multi_reduction <maximumf>, %63, %cst_20 [2] : vector<4x16x16xf32> to vector<4x16xf32>
    %65 = vector.shape_cast %64 : vector<4x16xf32> to vector<4x16x1xf32>
    %66 = vector.broadcast %65 : vector<4x16x1xf32> to vector<4x16x16xf32>
    %67 = arith.subf %63, %66 : vector<4x16x16xf32>
    %68 = math.exp %67 : vector<4x16x16xf32>
    %cst_21 = arith.constant dense<0.000000e+00> : vector<4x16xf32>
    %69 = vector.multi_reduction <add>, %68, %cst_21 [2] : vector<4x16x16xf32> to vector<4x16xf32>
    %70 = vector.shape_cast %69 : vector<4x16xf32> to vector<4x16x1xf32>
    %71 = tpu.reciprocal %70 {approx = true} : vector<4x16x1xf32> -> vector<4x16x1xf32>
    %72 = vector.broadcast %71 : vector<4x16x1xf32> to vector<4x16x16xf32>
    %73 = arith.mulf %68, %72 : vector<4x16x16xf32>
    "tpu.trace_start"() <{level = 10 : i32, message = "hdk,hqk->hdq"}> : () -> ()
    %cst_22 = arith.constant dense<0.000000e+00> : vector<4x8x16xf32>
    %74 = tpu.matmul %57, %73, %cst_22 {dimension_numbers = #tpu.dot_dimension_numbers<[2], [2], [1], [1], [0, 0, 0, 1, 1, 1], [0], [0]>} : vector<4x8x16xf32>, vector<4x16x16xf32>, vector<4x8x16xf32> -> vector<4x8x16xf32>
    "tpu.trace_stop"() : () -> ()
    %75 = vector.shape_cast %74 : vector<4x8x16xf32> to vector<32x16xf32>
    %76 = tpu.transpose %75, [1, 0] : vector<32x16xf32> -> vector<16x32xf32>
    %c0_23 = arith.constant 0 : index
    %c0_24 = arith.constant 0 : index
    %c0_25 = arith.constant 0 : index
    %77 = vector.load %arg9[%c0_23, %c0_24, %c0_25] : memref<2x32x32xf32, #tpu.memory_space<vmem>>, vector<1x32x32xf32>
    %78 = vector.shape_cast %77 : vector<1x32x32xf32> to vector<32x32xf32>
    %cst_26 = arith.constant dense<0.000000e+00> : vector<16x32xf32>
    %79 = tpu.matmul %76, %78, %cst_26 {dimension_numbers = #tpu.dot_dimension_numbers<[1], [0], [0], [1], [0, 0, 1, 1], [], []>} : vector<16x32xf32>, vector<32x32xf32>, vector<16x32xf32> -> vector<16x32xf32>
    %80 = arith.addf %0, %79 : vector<16x32xf32>
    %c0_27 = arith.constant 0 : index
    %c0_28 = arith.constant 0 : index
    %c0_29 = arith.constant 0 : index
    %81 = vector.load %arg10[%c0_27, %c0_28, %c0_29] : memref<2x1x32xf32, #tpu.memory_space<vmem>>, vector<1x1x32xf32>
    %82 = vector.shape_cast %81 : vector<1x1x32xf32> to vector<1x32xf32>
    %83 = vector.broadcast %82 : vector<1x32xf32> to vector<16x32xf32>
    %84 = arith.addf %80, %83 : vector<16x32xf32>
    %c0_30 = arith.constant 0 : index
    %c0_31 = arith.constant 0 : index
    %85 = vector.load %arg5[%c0_30, %c0_31] : memref<32x32xf32, #tpu.memory_space<vmem>>, vector<32x32xf32>
    %c0_32 = arith.constant 0 : index
    %c0_33 = arith.constant 0 : index
    %86 = vector.load %arg1[%c0_32, %c0_33] : memref<16x32xf32, #tpu.memory_space<vmem>>, vector<16x32xf32>
    %87 = tpu.transpose %86, [1, 0] : vector<16x32xf32> -> vector<32x16xf32>
    %cst_34 = arith.constant dense<0.000000e+00> : vector<32x16xf32>
    %88 = tpu.matmul %85, %87, %cst_34 {dimension_numbers = #tpu.dot_dimension_numbers<[1], [0], [0], [1], [0, 0, 1, 1], [], []>} : vector<32x32xf32>, vector<32x16xf32>, vector<32x16xf32> -> vector<32x16xf32>
    %c0_35 = arith.constant 0 : index
    %c0_36 = arith.constant 0 : index
    %89 = vector.load %arg6[%c0_35, %c0_36] : memref<32x1xf32, #tpu.memory_space<vmem>>, vector<32x1xf32>
    %90 = vector.broadcast %89 : vector<32x1xf32> to vector<32x16xf32>
    %91 = arith.addf %88, %90 : vector<32x16xf32>
    %c0_37 = arith.constant 0 : index
    %c0_38 = arith.constant 0 : index
    %92 = vector.load %arg7[%c0_37, %c0_38] : memref<64x32xf32, #tpu.memory_space<vmem>>, vector<64x32xf32>
    %93 = tpu.transpose %84, [1, 0] : vector<16x32xf32> -> vector<32x16xf32>
    %cst_39 = arith.constant dense<0.000000e+00> : vector<64x16xf32>
    %94 = tpu.matmul %92, %93, %cst_39 {dimension_numbers = #tpu.dot_dimension_numbers<[1], [0], [0], [1], [0, 0, 1, 1], [], []>} : vector<64x32xf32>, vector<32x16xf32>, vector<64x16xf32> -> vector<64x16xf32>
    %c0_40 = arith.constant 0 : index
    %c0_41 = arith.constant 0 : index
    %95 = vector.load %arg8[%c0_40, %c0_41] : memref<64x1xf32, #tpu.memory_space<vmem>>, vector<64x1xf32>
    %96 = vector.broadcast %95 : vector<64x1xf32> to vector<64x16xf32>
    %97 = arith.addf %94, %96 : vector<64x16xf32>
    %98 = vector.shape_cast %97 : vector<64x16xf32> to vector<2x4x8x16xf32>
    %99 = vector.shape_cast %91 : vector<32x16xf32> to vector<4x8x16xf32>
    %100 = vector.extract_strided_slice %99 {offsets = [0, 0, 0], sizes = [1, 8, 16], strides = [1, 1, 1]} : vector<4x8x16xf32> to vector<1x8x16xf32>
    %101 = vector.shape_cast %100 : vector<1x8x16xf32> to vector<8x16xf32>
    %102 = tpu.transpose %101, [1, 0] : vector<8x16xf32> -> vector<16x8xf32>
    %103 = vector.extract_strided_slice %99 {offsets = [1, 0, 0], sizes = [1, 8, 16], strides = [1, 1, 1]} : vector<4x8x16xf32> to vector<1x8x16xf32>
    %104 = vector.shape_cast %103 : vector<1x8x16xf32> to vector<8x16xf32>
    %105 = tpu.transpose %104, [1, 0] : vector<8x16xf32> -> vector<16x8xf32>
    %106 = vector.extract_strided_slice %99 {offsets = [2, 0, 0], sizes = [1, 8, 16], strides = [1, 1, 1]} : vector<4x8x16xf32> to vector<1x8x16xf32>
    %107 = vector.shape_cast %106 : vector<1x8x16xf32> to vector<8x16xf32>
    %108 = tpu.transpose %107, [1, 0] : vector<8x16xf32> -> vector<16x8xf32>
    %109 = vector.extract_strided_slice %99 {offsets = [3, 0, 0], sizes = [1, 8, 16], strides = [1, 1, 1]} : vector<4x8x16xf32> to vector<1x8x16xf32>
    %110 = vector.shape_cast %109 : vector<1x8x16xf32> to vector<8x16xf32>
    %111 = tpu.transpose %110, [1, 0] : vector<8x16xf32> -> vector<16x8xf32>
    %112 = vector.shape_cast %102 : vector<16x8xf32> to vector<1x16x8xf32>
    %113 = vector.shape_cast %105 : vector<16x8xf32> to vector<1x16x8xf32>
    %114 = vector.shape_cast %108 : vector<16x8xf32> to vector<1x16x8xf32>
    %115 = vector.shape_cast %111 : vector<16x8xf32> to vector<1x16x8xf32>
    %116 = tpu.concatenate %112, %113, %114, %115 in 0 : vector<1x16x8xf32>, vector<1x16x8xf32>, vector<1x16x8xf32>, vector<1x16x8xf32> -> vector<4x16x8xf32>
    %117 = vector.extract_strided_slice %98 {offsets = [0, 0, 0, 0], sizes = [1, 4, 8, 16], strides = [1, 1, 1, 1]} : vector<2x4x8x16xf32> to vector<1x4x8x16xf32>
    %118 = vector.shape_cast %117 : vector<1x4x8x16xf32> to vector<4x8x16xf32>
    %119 = vector.extract_strided_slice %98 {offsets = [1, 0, 0, 0], sizes = [1, 4, 8, 16], strides = [1, 1, 1, 1]} : vector<2x4x8x16xf32> to vector<1x4x8x16xf32>
    %120 = vector.shape_cast %119 : vector<1x4x8x16xf32> to vector<4x8x16xf32>
    "tpu.trace_start"() <{level = 10 : i32, message = "hqd,hdk->hqk"}> : () -> ()
    %cst_42 = arith.constant dense<0.000000e+00> : vector<4x16x16xf32>
    %121 = tpu.matmul %116, %118, %cst_42 {dimension_numbers = #tpu.dot_dimension_numbers<[2], [1], [1], [2], [0, 0, 0, 1, 1, 2], [0], [0]>} : vector<4x16x8xf32>, vector<4x8x16xf32>, vector<4x16x16xf32> -> vector<4x16x16xf32>
    "tpu.trace_stop"() : () -> ()
    %cst_43 = arith.constant 0.353553385 : f32
    %122 = vector.broadcast %cst_43 : f32 to vector<4x16x16xf32>
    %123 = arith.mulf %121, %122 : vector<4x16x16xf32>
    %124 = vector.shape_cast %1 : vector<16x16xf32> to vector<1x16x16xf32>
    %125 = vector.broadcast %124 : vector<1x16x16xf32> to vector<4x16x16xf32>
    %126 = arith.addf %123, %125 : vector<4x16x16xf32>
    %cst_44 = arith.constant dense<0xFF800000> : vector<4x16xf32>
    %127 = vector.multi_reduction <maximumf>, %126, %cst_44 [2] : vector<4x16x16xf32> to vector<4x16xf32>
    %128 = vector.shape_cast %127 : vector<4x16xf32> to vector<4x16x1xf32>
    %129 = vector.broadcast %128 : vector<4x16x1xf32> to vector<4x16x16xf32>
    %130 = arith.subf %126, %129 : vector<4x16x16xf32>
    %131 = math.exp %130 : vector<4x16x16xf32>
    %cst_45 = arith.constant dense<0.000000e+00> : vector<4x16xf32>
    %132 = vector.multi_reduction <add>, %131, %cst_45 [2] : vector<4x16x16xf32> to vector<4x16xf32>
    %133 = vector.shape_cast %132 : vector<4x16xf32> to vector<4x16x1xf32>
    %134 = tpu.reciprocal %133 {approx = true} : vector<4x16x1xf32> -> vector<4x16x1xf32>
    %135 = vector.broadcast %134 : vector<4x16x1xf32> to vector<4x16x16xf32>
    %136 = arith.mulf %131, %135 : vector<4x16x16xf32>
    "tpu.trace_start"() <{level = 10 : i32, message = "hdk,hqk->hdq"}> : () -> ()
    %cst_46 = arith.constant dense<0.000000e+00> : vector<4x8x16xf32>
    %137 = tpu.matmul %120, %136, %cst_46 {dimension_numbers = #tpu.dot_dimension_numbers<[2], [2], [1], [1], [0, 0, 0, 1, 1, 1], [0], [0]>} : vector<4x8x16xf32>, vector<4x16x16xf32>, vector<4x8x16xf32> -> vector<4x8x16xf32>
    "tpu.trace_stop"() : () -> ()
    %138 = vector.shape_cast %137 : vector<4x8x16xf32> to vector<32x16xf32>
    %139 = tpu.transpose %138, [1, 0] : vector<32x16xf32> -> vector<16x32xf32>
    %c1 = arith.constant 1 : index
    %c0_47 = arith.constant 0 : index
    %c0_48 = arith.constant 0 : index
    %140 = vector.load %arg9[%c1, %c0_47, %c0_48] : memref<2x32x32xf32, #tpu.memory_space<vmem>>, vector<1x32x32xf32>
    %141 = vector.shape_cast %140 : vector<1x32x32xf32> to vector<32x32xf32>
    %cst_49 = arith.constant dense<0.000000e+00> : vector<16x32xf32>
    %142 = tpu.matmul %139, %141, %cst_49 {dimension_numbers = #tpu.dot_dimension_numbers<[1], [0], [0], [1], [0, 0, 1, 1], [], []>} : vector<16x32xf32>, vector<32x32xf32>, vector<16x32xf32> -> vector<16x32xf32>
    %143 = arith.addf %84, %142 : vector<16x32xf32>
    %c1_50 = arith.constant 1 : index
    %c0_51 = arith.constant 0 : index
    %c0_52 = arith.constant 0 : index
    %144 = vector.load %arg10[%c1_50, %c0_51, %c0_52] : memref<2x1x32xf32, #tpu.memory_space<vmem>>, vector<1x1x32xf32>
    %145 = vector.shape_cast %144 : vector<1x1x32xf32> to vector<1x32xf32>
    %146 = vector.broadcast %145 : vector<1x32xf32> to vector<16x32xf32>
    %147 = arith.addf %143, %146 : vector<16x32xf32>
    %c1_53 = arith.constant 1 : index
    %c0_54 = arith.constant 0 : index
    %c0_55 = arith.constant 0 : index
    %148 = vector.load %arg11[%c1_53, %c0_54, %c0_55] : memref<3x1x32xf32, #tpu.memory_space<vmem>>, vector<1x1x32xf32>
    %149 = vector.shape_cast %148 : vector<1x1x32xf32> to vector<1x32xf32>
    %c1_56 = arith.constant 1 : index
    %c0_57 = arith.constant 0 : index
    %c0_58 = arith.constant 0 : index
    %150 = vector.load %arg12[%c1_56, %c0_57, %c0_58] : memref<3x1x32xf32, #tpu.memory_space<vmem>>, vector<1x1x32xf32>
    %151 = vector.shape_cast %150 : vector<1x1x32xf32> to vector<1x32xf32>
    %cst_59 = arith.constant dense<0.000000e+00> : vector<16xf32>
    %152 = vector.multi_reduction <add>, %147, %cst_59 [1] : vector<16x32xf32> to vector<16xf32>
    %153 = vector.shape_cast %152 : vector<16xf32> to vector<16x1xf32>
    %cst_60 = arith.constant 3.200000e+01 : f32
    %154 = vector.broadcast %cst_60 : f32 to vector<16x1xf32>
    %155 = arith.divf %153, %154 : vector<16x1xf32>
    %156 = vector.broadcast %155 : vector<16x1xf32> to vector<16x32xf32>
    %157 = arith.subf %147, %156 : vector<16x32xf32>
    %158 = arith.mulf %157, %157 : vector<16x32xf32>
    %cst_61 = arith.constant dense<0.000000e+00> : vector<16xf32>
    %159 = vector.multi_reduction <add>, %158, %cst_61 [1] : vector<16x32xf32> to vector<16xf32>
    %160 = vector.shape_cast %159 : vector<16xf32> to vector<16x1xf32>
    %cst_62 = arith.constant 3.200000e+01 : f32
    %161 = vector.broadcast %cst_62 : f32 to vector<16x1xf32>
    %162 = arith.divf %160, %161 : vector<16x1xf32>
    %163 = vector.broadcast %155 : vector<16x1xf32> to vector<16x32xf32>
    %164 = arith.subf %147, %163 : vector<16x32xf32>
    %cst_63 = arith.constant 9.99999974E-6 : f32
    %165 = vector.broadcast %cst_63 : f32 to vector<16x1xf32>
    %166 = arith.addf %162, %165 : vector<16x1xf32>
    %167 = math.rsqrt %166 : vector<16x1xf32>
    %168 = vector.broadcast %167 : vector<16x1xf32> to vector<16x32xf32>
    %169 = arith.mulf %164, %168 : vector<16x32xf32>
    %170 = vector.broadcast %149 : vector<1x32xf32> to vector<16x32xf32>
    %171 = arith.mulf %169, %170 : vector<16x32xf32>
    %172 = vector.broadcast %151 : vector<1x32xf32> to vector<16x32xf32>
    %173 = arith.addf %171, %172 : vector<16x32xf32>
    %c2 = arith.constant 2 : index
    %c0_64 = arith.constant 0 : index
    %c0_65 = arith.constant 0 : index
    %174 = vector.load %arg11[%c2, %c0_64, %c0_65] : memref<3x1x32xf32, #tpu.memory_space<vmem>>, vector<1x1x32xf32>
    %175 = vector.shape_cast %174 : vector<1x1x32xf32> to vector<1x32xf32>
    %c2_66 = arith.constant 2 : index
    %c0_67 = arith.constant 0 : index
    %c0_68 = arith.constant 0 : index
    %176 = vector.load %arg12[%c2_66, %c0_67, %c0_68] : memref<3x1x32xf32, #tpu.memory_space<vmem>>, vector<1x1x32xf32>
    %177 = vector.shape_cast %176 : vector<1x1x32xf32> to vector<1x32xf32>
    %cst_69 = arith.constant dense<0.000000e+00> : vector<16xf32>
    %178 = vector.multi_reduction <add>, %173, %cst_69 [1] : vector<16x32xf32> to vector<16xf32>
    %179 = vector.shape_cast %178 : vector<16xf32> to vector<16x1xf32>
    %cst_70 = arith.constant 3.200000e+01 : f32
    %180 = vector.broadcast %cst_70 : f32 to vector<16x1xf32>
    %181 = arith.divf %179, %180 : vector<16x1xf32>
    %182 = vector.broadcast %181 : vector<16x1xf32> to vector<16x32xf32>
    %183 = arith.subf %173, %182 : vector<16x32xf32>
    %184 = arith.mulf %183, %183 : vector<16x32xf32>
    %cst_71 = arith.constant dense<0.000000e+00> : vector<16xf32>
    %185 = vector.multi_reduction <add>, %184, %cst_71 [1] : vector<16x32xf32> to vector<16xf32>
    %186 = vector.shape_cast %185 : vector<16xf32> to vector<16x1xf32>
    %cst_72 = arith.constant 3.200000e+01 : f32
    %187 = vector.broadcast %cst_72 : f32 to vector<16x1xf32>
    %188 = arith.divf %186, %187 : vector<16x1xf32>
    %189 = vector.broadcast %181 : vector<16x1xf32> to vector<16x32xf32>
    %190 = arith.subf %173, %189 : vector<16x32xf32>
    %cst_73 = arith.constant 9.99999974E-6 : f32
    %191 = vector.broadcast %cst_73 : f32 to vector<16x1xf32>
    %192 = arith.addf %188, %191 : vector<16x1xf32>
    %193 = math.rsqrt %192 : vector<16x1xf32>
    %194 = vector.broadcast %193 : vector<16x1xf32> to vector<16x32xf32>
    %195 = arith.mulf %190, %194 : vector<16x32xf32>
    %196 = vector.broadcast %175 : vector<1x32xf32> to vector<16x32xf32>
    %197 = arith.mulf %195, %196 : vector<16x32xf32>
    %198 = vector.broadcast %177 : vector<1x32xf32> to vector<16x32xf32>
    %199 = arith.addf %197, %198 : vector<16x32xf32>
    %c0_74 = arith.constant 0 : index
    %c0_75 = arith.constant 0 : index
    %200 = vector.load %arg13[%c0_74, %c0_75] : memref<32x64xf32, #tpu.memory_space<vmem>>, vector<32x64xf32>
    %cst_76 = arith.constant dense<0.000000e+00> : vector<16x64xf32>
    %201 = tpu.matmul %199, %200, %cst_76 {dimension_numbers = #tpu.dot_dimension_numbers<[1], [0], [0], [1], [0, 0, 1, 1], [], []>} : vector<16x32xf32>, vector<32x64xf32>, vector<16x64xf32> -> vector<16x64xf32>
    %c0_77 = arith.constant 0 : index
    %c0_78 = arith.constant 0 : index
    %202 = vector.load %arg14[%c0_77, %c0_78] : memref<1x64xf32, #tpu.memory_space<vmem>>, vector<1x64xf32>
    %203 = vector.broadcast %202 : vector<1x64xf32> to vector<16x64xf32>
    %204 = arith.addf %201, %203 : vector<16x64xf32>
    %cst_79 = arith.constant 0.000000e+00 : f32
    %205 = vector.broadcast %cst_79 : f32 to vector<16x64xf32>
    %206 = arith.maximumf %204, %205 : vector<16x64xf32>
    %c0_80 = arith.constant 0 : index
    %c0_81 = arith.constant 0 : index
    %207 = vector.load %arg15[%c0_80, %c0_81] : memref<64x32xf32, #tpu.memory_space<vmem>>, vector<64x32xf32>
    %cst_82 = arith.constant dense<0.000000e+00> : vector<16x32xf32>
    %208 = tpu.matmul %206, %207, %cst_82 {dimension_numbers = #tpu.dot_dimension_numbers<[1], [0], [0], [1], [0, 0, 1, 1], [], []>} : vector<16x64xf32>, vector<64x32xf32>, vector<16x32xf32> -> vector<16x32xf32>
    %209 = arith.addf %173, %208 : vector<16x32xf32>
    %c0_83 = arith.constant 0 : index
    %c0_84 = arith.constant 0 : index
    %210 = vector.load %arg16[%c0_83, %c0_84] : memref<1x32xf32, #tpu.memory_space<vmem>>, vector<1x32xf32>
    %211 = vector.broadcast %210 : vector<1x32xf32> to vector<16x32xf32>
    %212 = arith.addf %209, %211 : vector<16x32xf32>
    %c0_85 = arith.constant 0 : index
    %c0_86 = arith.constant 0 : index
    %213 = vector.load %arg17[%c0_85, %c0_86] : memref<16x32xf32, #tpu.memory_space<vmem>>, vector<16x32xf32>
    tpu.vector_store %arg17[%c0_85, %c0_86], %212 {strides = array<i32>} : memref<16x32xf32, #tpu.memory_space<vmem>>, vector<16x32xf32>,
    return
  }
}

</mosaic_0001>

<bundles_post_ra>
// kernel: decoder_layer.1
= control target key start
LH: loop header
LB: loop body
LE: loop exit
PB: predicated region body
PF: predicated region fallthrough
CT: control target
= control target key end

     0   :  { %s4125_s0 = inlined_call_operand.vmem [shape: f32[16,32], index: 0, kind: input, shape index: {}]   ;;  %s4126_s1 = inlined_call_operand.vmem [shape: f32[16,32], index: 1, kind: input, shape index: {}]   ;;  %s4127_s2 = inlined_call_operand.vmem [shape: f32[16,16], index: 2, kind: input, shape index: {}]   ;;  %s4128_s3 = inlined_call_operand.vmem [shape: f32[96,32], index: 3, kind: input, shape index: {}]   ;;  %s4129_s4 = inlined_call_operand.vmem [shape: f32[96,1], index: 4, kind: input, shape index: {}]   ;;  %s4130_s5 = inlined_call_operand.vmem [shape: f32[32,32], index: 5, kind: input, shape index: {}]   ;;  %s4131_s6 = inlined_call_operand.vmem [shape: f32[32,1], index: 6, kind: input, shape index: {}]   ;;  %s4132_s7 = inlined_call_operand.vmem [shape: f32[64,32], index: 7, kind: input, shape index: {}]   ;;  %s4133_s8 = inlined_call_operand.vmem [shape: f32[64,1], index: 8, kind: input, shape index: {}]   ;;  %s4134_s9 = inlined_call_operand.vmem [shape: f32[2,32,32], index: 9, kind: input, shape index: {}]   ;;  %s4135_s10 = inlined_call_operand.vmem [shape: f32[2,1,32], index: 10, kind: input, shape index: {}]   ;;  %s4136_s11 = inlined_call_operand.vmem [shape: f32[3,1,32], index: 11, kind: input, shape index: {}]   ;;  %s4137_s12 = inlined_call_operand.vmem [shape: f32[3,1,32], index: 12, kind: input, shape index: {}]   ;;  %s4138_s13 = inlined_call_operand.vmem [shape: f32[32,64], index: 13, kind: input, shape index: {}]   ;;  %s4139_s14 = inlined_call_operand.vmem [shape: f32[1,64], index: 14, kind: input, shape index: {}]   ;;  %s4140_s15 = inlined_call_operand.vmem [shape: f32[64,32], index: 15, kind: input, shape index: {}]   ;;  %s4141_s16 = inlined_call_operand.vmem [shape: f32[1,32], index: 16, kind: input, shape index: {}]   ;;  %s4142_s17 = inlined_call_operand.hbm [shape: f32[16,32], index: 17, kind: output, shape index: {}]  }
   0x1   :  { %4145 = sst [smem:[#allocation5_spill]] %s4125_s0 }
   0x2   :  { %4146 = sst [smem:[#allocation6_spill]] %s4126_s1 }
   0x3   :  { %s4147_s26 = sld [smem:[#allocation5_spill]]  ;;  %vm63_vm0 = vcmask 261120  }
   0x9   :  { %v3595_v0 = vld [vmem:[%s4147_s26 + $0x8] sm:$0xff]  ;;  %v3600_v1 = vld [vmem:[%s4147_s26] sm:$0xff] }
   0xa   :  { %22 = vsyncpa [#allocation3], 0  ;;  %v67_v2 = vsel %vm63_vm0, %v3595_v0, 0.0  ;;  %v64_v3 = vsel %vm63_vm0, %v3600_v1, 0.0  ;;  %v107_v14 = vld [vmem:[%s4128_s3] sm:$0xff]  ;;  %v120_v15 = vld [vmem:[%s4129_s4 + $0x8] sm:$0xff] }
   0xb   :  { %68 = vadd.xlane.f32.xlu0 %v67_v2  ;;  %3198 = vmatprep.mubr.msk.f32.mxu0 %vm63_vm0, %v107_v14  ;;  %v3496_v16 = vmov 0   ;;  %v119_v17 = vld [vmem:[%s4129_s4] sm:$0xff]  ;;  %v121_v18 = vld [vmem:[%s4129_s4 + $0x10] sm:$0xff]  ;;  %v122_v19 = vld [vmem:[%s4129_s4 + $0x18] sm:$0xff]  ;;  %vm486_vm1 = vcmask 64512   ;;  %vm827_vm2 = vcmask 130048  }
   0xc   :  { %3397 = vset.pattern.permute.xlu1 %v3496_v16  ;;  %3396 = vset.pattern.permute.xlu0 %v3496_v16  ;;  %v123_v20 = vld [vmem:[%s4129_s4 + $0x20] sm:$0xff]  ;;  %v124_v21 = vld [vmem:[%s4129_s4 + $0x28] sm:$0xff]  ;;  %v125_v22 = vld [vmem:[%s4129_s4 + $0x30] sm:$0xff]  ;;  %vm3498_vm3 = vmmov 0   ;;  %s4148_s22 = sld [smem:[#allocation6_spill]]  ;;  %vm2880_vm4 = vcmask 523264  }
   0xd   :  { %v126_v23 = vld [vmem:[%s4129_s4 + $0x38] sm:$0xff]  ;;  %v2991_v31 = vld [vmem:[%s4136_s11] ss:$0 sm:$0xff]  ;;  %v108_v40 = vld [vmem:[%s4128_s3 + $0x8] sm:$0xff] }
   0xe   :  { %v2992_v33 = vld [vmem:[%s4137_s12] ss:$0 sm:$0xff]  ;;  %v109_v41 = vld [vmem:[%s4128_s3 + $0x10] sm:$0xff]  ;;  %v110_v42 = vld [vmem:[%s4128_s3 + $0x18] sm:$0xff] }
   0xf   :  { %65 = vadd.xlane.f32.xlu0 %v64_v3  ;;  %v111_v43 = vld [vmem:[%s4128_s3 + $0x20] sm:$0xff]  ;;  %v112_v44 = vld [vmem:[%s4128_s3 + $0x28] sm:$0xff]  ;;  %v113_v45 = vld [vmem:[%s4128_s3 + $0x30] sm:$0xff] }
  0x10   :  { %v114_v46 = vld [vmem:[%s4128_s3 + $0x38] sm:$0xff] }
  0x25   :  { %133 = vperm.xlu0 %3396, %v119_v17   ;;  %v115_v17 = vld [vmem:[%s4128_s3 + $0x40] sm:$0xff] }
  0x94   :  { %v69_v4 = vpop.xlane.xlu0 %68 }
  0x95   :  { %v72_v5 = vmul.f32 0.03125, %v69_v4 }
  0x97   :  { %v74_v6 = vsub.f32 %v3595_v0, %v72_v5 }
  0x98   :  { %v66_v7 = vpop.xlane.xlu0 %65 }
  0x99   :  { %v71_v8 = vmul.f32 0.03125, %v66_v7  ;;  %v76_v9 = vmul.f32 %v74_v6, %v74_v6 }
  0x9b   :  { %v73_v10 = vsub.f32 %v3600_v1, %v71_v8  ;;  %v80_v11 = vsel %vm63_vm0, %v76_v9, 0.0 }
  0x9c   :  { %81 = vadd.xlane.f32.xlu1 %v80_v11 }
  0x9d   :  { %v75_v12 = vmul.f32 %v73_v10, %v73_v10 }
  0x9f   :  { %v77_v13 = vsel %vm63_vm0, %v75_v12, 0.0 }
  0xa0   :  { %78 = vadd.xlane.f32.xlu1 %v77_v13  ;;  %v134_v51 = vpop.permute.xlu0 %133 }
  0xb1   :  { %138 = vperm.xlu1 %3397, %v120_v15  }
  0xb5   :  { %143 = vperm.xlu1 %3397, %v121_v18   ;;  %v116_v18 = vld [vmem:[%s4128_s3 + $0x48] sm:$0xff] }
  0xb9   :  { %148 = vperm.xlu1 %3397, %v122_v19   ;;  %v117_v19 = vld [vmem:[%s4128_s3 + $0x50] sm:$0xff] }
  0xbd   :  { %153 = vperm.xlu1 %3397, %v123_v20   ;;  %v118_v20 = vld [vmem:[%s4128_s3 + $0x58] sm:$0xff] }
  0xc1   :  { %158 = vperm.xlu1 %3397, %v124_v21  }
  0xc5   :  { %163 = vperm.xlu1 %3397, %v125_v22   ;;  %v3703_v22 = vld [vmem:[%s4127_s2 + $0x8] sm:$0xff] }
  0xc9   :  { %168 = vperm.xlu1 %3397, %v126_v23  }
 0x125   :  { %v82_v24 = vpop.xlane.xlu1 %81 }
 0x126   :  { %v84_v25 = vmul.f32 0.03125, %v82_v24 }
 0x128   :  { %v86_v26 = vadd.f32 1e-05, %v84_v25  ;;  %v3708_v25 = vld [vmem:[%s4127_s2] sm:$0xff] }
 0x129   :  { %v79_v27 = vpop.xlane.xlu1 %78 }
 0x12a   :  { %3398 = vrsqrt.f32 %v86_v26  ;;  %v83_v28 = vmul.f32 0.03125, %v79_v27 }
 0x12c   :  { %v85_v29 = vadd.f32 1e-05, %v83_v28 }
 0x12d   :  { %v139_v47 = vpop.permute.xlu1 %138 }
 0x12e   :  { %3400 = vrsqrt.f32 %v85_v29 }
 0x131   :  { %v144_v48 = vpop.permute.xlu1 %143 }
 0x135   :  { %v149_v49 = vpop.permute.xlu1 %148 }
 0x137   :  { %v3399_v30 = vpop.eup %3398 }
 0x138   :  { %v90_v32 = vmul.f32 %v3399_v30, %v74_v6 }
 0x139   :  { %v154_v56 = vpop.permute.xlu1 %153 }
 0x13a   :  { %v98_v34 = vmul.f32 %v2991_v31, %v90_v32 }
 0x13b   :  { %v3401_v35 = vpop.eup %3400 }
 0x13c   :  { %v89_v36 = vmul.f32 %v3401_v35, %v73_v10  ;;  %v106_v37 = vadd.f32 %v2992_v33, %v98_v34 }
 0x13d   :  { %v159_v62 = vpop.permute.xlu1 %158 }
 0x13e   :  { %v97_v38 = vmul.f32 %v2991_v31, %v89_v36  ;;  %3194 = vmatprep.subr.msk.mxu0 %vm63_vm0, %v106_v37 }
 0x13f   :  { %3195 = vmatpush3.xpose.msk.msra.mxu0 %vm63_vm0, %v106_v37 }
 0x140   :  { %v105_v39 = vadd.f32 %v2992_v33, %v97_v38 }
 0x141   :  { %v164_v3 = vpop.permute.xlu1 %163 }
 0x142   :  { %3196 = vmatprep.subr.msk.mxu0 %vm63_vm0, %v105_v39 }
 0x143   :  { %3197 = vmatpush3.xpose.msk.msra.mxu0 %vm63_vm0, %v105_v39 }
 0x145   :  { %v169_v4 = vpop.permute.xlu1 %168 }
 0x146   :  { %3199 = vmatmul.mubr.msk.f32.vlgmr.msra.gmra.mxu0 %vm63_vm0, %v108_v40 }
 0x147   :  { %3201 = vmatprep.mubr.msk.f32.mxu0 %vm63_vm0, %v109_v41 }
 0x14a   :  { %3202 = vmatmul.mubr.msk.f32.gmra.mxu0 %vm63_vm0, %v110_v42 }
 0x14b   :  { %3204 = vmatprep.mubr.msk.f32.mxu0 %vm63_vm0, %v111_v43 }
 0x14e   :  { %3205 = vmatmul.mubr.msk.f32.gmra.mxu0 %vm63_vm0, %v112_v44 }
 0x14f   :  { %3207 = vmatprep.mubr.msk.f32.mxu0 %vm63_vm0, %v113_v45 }
 0x152   :  { %3208 = vmatmul.mubr.msk.f32.gmra.mxu0 %vm63_vm0, %v114_v46 }
 0x153   :  { %3210 = vmatprep.mubr.msk.f32.mxu0 %vm63_vm0, %v115_v17 }
 0x156   :  { %3211 = vmatmul.mubr.msk.f32.gmra.mxu0 %vm63_vm0, %v116_v18 }
 0x157   :  { %3213 = vmatprep.mubr.msk.f32.mxu0 %vm63_vm0, %v117_v19 }
 0x15a   :  { %3214 = vmatmul.mubr.msk.f32.gmra.mxu0 %vm63_vm0, %v118_v20 }
 0x206   :  { %v3200_v50 = vpop.f32.mrf.mxu0 }
 0x207   :  { %v305_v52 = vadd.f32 %v3200_v50, %v139_v47 }
 0x208   :  { %v299_v53 = vpop.f32.mrf.mxu0 }
 0x209   :  { %v300_v54 = vadd.f32 %v299_v53, %v134_v51  ;;  %390 = vxpose.xlu0.b32.start.end [1/1] (short) (narrow) %v305_v52, 16 }
 0x20a   :  { %v3203_v55 = vpop.f32.mrf.mxu0 }
 0x20b   :  { %358 = vxpose.xlu1.b32.start.end [1/1] (short) (narrow) %v300_v54, 16  ;;  %v315_v63 = vadd.f32 %v3203_v55, %v149_v49 }
 0x20c   :  { %v309_v57 = vpop.f32.mrf.mxu0 }
 0x20d   :  { %v310_v58 = vadd.f32 %v309_v57, %v144_v48 }
 0x20e   :  { %v3206_v59 = vpop.f32.mrf.mxu0 }
 0x20f   :  { %422 = vxpose.xlu0.b32.start.end [1/1] (short) (narrow) %v310_v58, 16  ;;  %v325_v2 = vadd.f32 %v3206_v59, %v159_v62 }
 0x210   :  { %v319_v60 = vpop.f32.mrf.mxu0 }
 0x211   :  { %v320_v61 = vadd.f32 %v319_v60, %v154_v56 }
 0x212   :  { %v3209_v5 = vpop.f32.mrf.mxu0 }
 0x213   :  { %3216 = vmatprep.subr.mxu1 %v320_v61  ;;  %v335_v13 = vadd.f32 %v3209_v5, %v169_v4 }
 0x214   :  { %454 = vxpose.xlu0.b32.start.end [1/1] (short) (narrow) %v315_v63, 16  ;;  %3217 = vmatpush3.msra.mxu1 %v320_v61  ;;  %v329_v8 = vpop.f32.mrf.mxu0 }
 0x215   :  { %3221 = vmatprep.subr.mxu1 %v325_v2  ;;  %v330_v11 = vadd.f32 %v329_v8, %v164_v3 }
 0x285   :  { %v406_v6 = vpop.trf.xlu0 }
 0x287   :  { %v374_v7 = vpop.trf.xlu1 }
 0x288   :  { %3218 = vmatprep.mubr.msk.f32.mxu1 %vm486_vm1, %v374_v7 }
 0x289   :  { %v407_v9 = vpop.trf.xlu0 }
 0x28b   :  { %v375_v10 = vpop.trf.xlu1 }
 0x28c   :  { %3219 = vmatmul.mubr.msk.f32.vlgmr.msra.gmra.mxu1 %vm486_vm1, %v375_v10 }
 0x28d   :  { %3222 = vmatpush3.msra.mxu1 %v325_v2  ;;  %3223 = vmatprep.mubr.msk.f32.mxu1 %vm486_vm1, %v406_v6  ;;  %v438_v12 = vpop.trf.xlu0 }
 0x28e   :  { %3226 = vmatprep.subr.mxu1 %v330_v11 }
 0x290   :  { %3224 = vmatmul.mubr.msk.f32.vlgmr.msra.gmra.mxu1 %vm486_vm1, %v407_v9 }
 0x291   :  { %3227 = vmatpush3.msra.mxu1 %v330_v11  ;;  %v439_v14 = vpop.trf.xlu0  ;;  %3228 = vmatprep.mubr.msk.f32.mxu1 %vm486_vm1, %v438_v12 }
 0x292   :  { %3231 = vmatprep.subr.mxu1 %v335_v13 }
 0x294   :  { %3229 = vmatmul.mubr.msk.f32.vlgmr.msra.gmra.mxu1 %vm486_vm1, %v439_v14 }
 0x295   :  { %3232 = vmatpush3.msra.mxu1 %v335_v13  ;;  %v470_v15 = vpop.trf.xlu0 }
 0x296   :  { %3233 = vmatprep.mubr.msk.f32.mxu1 %vm486_vm1, %v470_v15 }
 0x299   :  { %v471_v16 = vpop.trf.xlu0 }
 0x29a   :  { %3234 = vmatmul.mubr.msk.f32.vlgmr.msra.gmra.mxu1 %vm486_vm1, %v471_v16 }
 0x34c   :  { %v3220_v21 = vpop.f32.mrf.mxu1 }
 0x34d   :  { %v812_v23 = vmul.f32 0.35355338, %v3220_v21 }
 0x34e   :  { %v559_v24 = vpop.f32.mrf.mxu1 }
 0x34f   :  { %v811_v26 = vmul.f32 0.35355338, %v559_v24  ;;  %v820_v27 = vadd.f32 %v812_v23, %v3703_v22  ;;  %v128_v24 = vld [vmem:[%s4129_s4 + $0x48] sm:$0xff] }
 0x350   :  { %v3225_v28 = vpop.f32.mrf.mxu1 }
 0x351   :  { %v814_v29 = vmul.f32 0.35355338, %v3225_v28  ;;  %v831_v30 = vsel %vm827_vm2, %v820_v27, -inf  ;;  %v819_v31 = vadd.f32 %v811_v26, %v3708_v25  ;;  %v3497_v26 = vmov 0.0   ;;  %v127_v28 = vld [vmem:[%s4129_s4 + $0x40] sm:$0xff] }
 0x352   :  { %832 = vmax.xlane.f32.xlu1 %v831_v30  ;;  %v640_v32 = vpop.f32.mrf.mxu1  ;;  %3236 = vmatprep.subr.mxu0 %v3497_v26 }
 0x353   :  { %v813_v33 = vmul.f32 0.35355338, %v640_v32  ;;  %v822_v34 = vadd.f32 %v814_v29, %v3703_v22  ;;  %v828_v37 = vsel %vm827_vm2, %v819_v31, -inf  ;;  %3243 = vmatprep.subr.mxu1 %v3497_v26  ;;  %3240 = vmatprep.mubr.msk.f32.mxu0 %vm3498_vm3, %v3497_v26 }
 0x354   :  { %v3230_v35 = vpop.f32.mrf.mxu1  ;;  %3247 = vmatprep.mubr.msk.f32.mxu1 %vm3498_vm3, %v3497_v26 }
 0x355   :  { %v816_v36 = vmul.f32 0.35355338, %v3230_v35  ;;  %v837_v38 = vsel %vm827_vm2, %v822_v34, -inf  ;;  %v821_v39 = vadd.f32 %v813_v33, %v3708_v25 }
 0x356   :  { %829 = vmax.xlane.f32.xlu1 %v828_v37  ;;  %838 = vmax.xlane.f32.xlu0 %v837_v38  ;;  %v721_v40 = vpop.f32.mrf.mxu1 }
 0x357   :  { %v815_v41 = vmul.f32 0.35355338, %v721_v40  ;;  %v824_v42 = vadd.f32 %v816_v36, %v3703_v22  ;;  %v834_v43 = vsel %vm827_vm2, %v821_v39, -inf  ;;  %v1366_v40 = vld [vmem:[%s4131_s6] sm:$0xff] }
 0x359   :  { %v843_v44 = vsel %vm827_vm2, %v824_v42, -inf  ;;  %v823_v45 = vadd.f32 %v815_v41, %v3708_v25  ;;  %v1367_v41 = vld [vmem:[%s4131_s6 + $0x8] sm:$0xff] }
 0x35a   :  { %835 = vmax.xlane.f32.xlu1 %v834_v43  ;;  %844 = vmax.xlane.f32.xlu0 %v843_v44  ;;  %v3235_v46 = vpop.f32.mrf.mxu1  ;;  %v1369_v43 = vld [vmem:[%s4131_s6 + $0x18] sm:$0xff]  ;;  %v1501_v44 = vld [vmem:[%s4133_s8] sm:$0xff] }
 0x35b   :  { %v818_v47 = vmul.f32 0.35355338, %v3235_v46  ;;  %v840_v48 = vsel %vm827_vm2, %v823_v45, -inf  ;;  %v1503_v46 = vld [vmem:[%s4133_s8 + $0x10] sm:$0xff] }
 0x35c   :  { %v802_v49 = vpop.f32.mrf.mxu1 }
 0x35d   :  { %v817_v50 = vmul.f32 0.35355338, %v802_v49  ;;  %v3723_v51 = vadd.f32 %v818_v47, %v3703_v22  ;;  %v1504_v47 = vld [vmem:[%s4133_s8 + $0x18] sm:$0xff] }
 0x35e   :  { %841 = vmax.xlane.f32.xlu0 %v840_v48 }
 0x35f   :  { %v849_v52 = vsel %vm827_vm2, %v3723_v51, -inf  ;;  %v3728_v53 = vadd.f32 %v817_v50, %v3708_v25 }
 0x360   :  { %850 = vmax.xlane.f32.xlu1 %v849_v52 }
 0x361   :  { %v846_v54 = vsel %vm827_vm2, %v3728_v53, -inf }
 0x364   :  { %847 = vmax.xlane.f32.xlu1 %v846_v54 }
 0x3db   :  { %v833_v55 = vpop.xlane.xlu1 %832 }
 0x3dc   :  { %v853_v56 = vsub.f32 %v820_v27, %v833_v55  ;;  %v129_v27 = vld [vmem:[%s4129_s4 + $0x50] sm:$0xff] }
 0x3de   :  { %v862_v57 = vmul.f32 1.442695, %v853_v56  ;;  %v3212_v56 = vpop.f32.mrf.mxu0 }
 0x3df   :  { %v830_v58 = vpop.xlane.xlu1 %829  ;;  %v839_v59 = vpop.xlane.xlu0 %838 }
 0x3e0   :  { %3402 = vpow2.f32 %v862_v57  ;;  %v852_v60 = vsub.f32 %v819_v31, %v830_v58  ;;  %v855_v61 = vsub.f32 %v822_v34, %v839_v59 }
 0x3e2   :  { %v860_v62 = vmul.f32 1.442695, %v852_v60  ;;  %v866_v63 = vmul.f32 1.442695, %v855_v61  ;;  %v339_v61 = vpop.f32.mrf.mxu0 }
 0x3e3   :  { %v836_v2 = vpop.xlane.xlu1 %835  ;;  %v845_v3 = vpop.xlane.xlu0 %844 }
 0x3e4   :  { %3404 = vpow2.f32 %v860_v62  ;;  %v854_v4 = vsub.f32 %v821_v39, %v836_v2  ;;  %v857_v5 = vsub.f32 %v824_v42, %v845_v3  ;;  %v130_v39 = vld [vmem:[%s4129_s4 + $0x58] sm:$0xff]  ;;  %v1368_v42 = vld [vmem:[%s4131_s6 + $0x10] sm:$0xff] }
 0x3e5   :  { %3406 = vpow2.f32 %v866_v63 }
 0x3e6   :  { %v864_v6 = vmul.f32 1.442695, %v854_v4  ;;  %v870_v7 = vmul.f32 1.442695, %v857_v5 }
 0x3e7   :  { %v842_v8 = vpop.xlane.xlu0 %841 }
 0x3e8   :  { %3408 = vpow2.f32 %v864_v6  ;;  %v856_v9 = vsub.f32 %v823_v45, %v842_v8  ;;  %v1502_v45 = vld [vmem:[%s4133_s8 + $0x8] sm:$0xff]  ;;  %v3215_v6 = vpop.f32.mrf.mxu0 }
 0x3e9   :  { %3410 = vpow2.f32 %v870_v7  ;;  %v851_v29 = vpop.xlane.xlu1 %850 }
 0x3ea   :  { %v868_v10 = vmul.f32 1.442695, %v856_v9  ;;  %v859_v30 = vsub.f32 %v3723_v51, %v851_v29  ;;  %v1362_v29 = vld [vmem:[%s4130_s5 + $0x10] sm:$0xff] }
 0x3ec   :  { %3412 = vpow2.f32 %v868_v10  ;;  %v874_v32 = vmul.f32 1.442695, %v859_v30  ;;  %v1363_v30 = vld [vmem:[%s4130_s5 + $0x18] sm:$0xff] }
 0x3ed   :  { %v3732_v11 = vpop.eup %3402  ;;  %v848_v31 = vpop.xlane.xlu1 %847 }
 0x3ee   :  { %v879_v12 = vsel %vm827_vm2, %v3732_v11, 0.0  ;;  %v858_v33 = vsub.f32 %v3728_v53, %v848_v31  ;;  %3414 = vpow2.f32 %v874_v32  ;;  %v1267_v31 = vld [vmem:[%s4134_s9 + $0x18] sm:$0xff]  ;;  %v1266_v32 = vld [vmem:[%s4134_s9 + $0x10] sm:$0xff] }
 0x3ef   :  { %880 = vadd.xlane.f32.xlu0 %v879_v12 }
 0x3f0   :  { %v872_v34 = vmul.f32 1.442695, %v858_v33 }
 0x3f1   :  { %v3736_v13 = vpop.eup %3404 }
 0x3f2   :  { %v3738_v14 = vpop.eup %3406  ;;  %v876_v15 = vsel %vm827_vm2, %v3736_v13, 0.0  ;;  %3416 = vpow2.f32 %v872_v34 }
 0x3f3   :  { %877 = vadd.xlane.f32.xlu0 %v876_v15  ;;  %v885_v16 = vsel %vm827_vm2, %v3738_v14, 0.0 }
 0x3f4   :  { %886 = vadd.xlane.f32.xlu1 %v885_v16 }
 0x3f5   :  { %v3744_v17 = vpop.eup %3408 }
 0x3f6   :  { %v3746_v18 = vpop.eup %3410  ;;  %v882_v19 = vsel %vm827_vm2, %v3744_v17, 0.0 }
 0x3f7   :  { %v891_v20 = vsel %vm827_vm2, %v3746_v18, 0.0 }
 0x3f8   :  { %883 = vadd.xlane.f32.xlu1 %v882_v19  ;;  %892 = vadd.xlane.f32.xlu0 %v891_v20 }
 0x3f9   :  { %v3752_v21 = vpop.eup %3412 }
 0x3fa   :  { %v888_v23 = vsel %vm827_vm2, %v3752_v21, 0.0 }
 0x3fb   :  { %v3773_v35 = vpop.eup %3414 }
 0x3fc   :  { %889 = vadd.xlane.f32.xlu0 %v888_v23  ;;  %v897_v36 = vsel %vm827_vm2, %v3773_v35, 0.0 }
 0x3ff   :  { %v3777_v37 = vpop.eup %3416 }
 0x400   :  { %v894_v38 = vsel %vm827_vm2, %v3777_v37, 0.0 }
 0x409   :  { %178 = vperm.xlu1 %3397, %v128_v24   ;;  %v1360_v24 = vld [vmem:[%s4130_s5] sm:$0xff] }
 0x40d   :  { %183 = vperm.xlu1 %3397, %v129_v27   ;;  %v1364_v27 = vld [vmem:[%s4148_s22] sm:$0xff] }
 0x412   :  { %173 = vperm.xlu0 %3396, %v127_v28   ;;  %v1361_v28 = vld [vmem:[%s4130_s5 + $0x8] sm:$0xff] }
 0x431   :  { %898 = vadd.xlane.f32.xlu1 %v897_v36 }
 0x435   :  { %895 = vadd.xlane.f32.xlu1 %v894_v38 }
 0x446   :  { %188 = vperm.xlu1 %3397, %v130_v39   ;;  %v1265_v39 = vld [vmem:[%s4134_s9 + $0x8] sm:$0xff] }
 0x44a   :  { %1372 = vperm.xlu1 %3397, %v1366_v40   ;;  %v1264_v40 = vld [vmem:[%s4134_s9] sm:$0xff] }
 0x44e   :  { %1377 = vperm.xlu1 %3397, %v1367_v41  }
 0x452   :  { %1382 = vperm.xlu1 %3397, %v1368_v42  }
 0x456   :  { %1387 = vperm.xlu1 %3397, %v1369_v43  }
 0x45a   :  { %1511 = vperm.xlu1 %3397, %v1501_v44  }
 0x45e   :  { %1516 = vperm.xlu1 %3397, %v1502_v45  }
 0x462   :  { %1521 = vperm.xlu1 %3397, %v1503_v46  }
 0x466   :  { %1526 = vperm.xlu1 %3397, %v1504_v47  }
 0x478   :  { %v881_v48 = vpop.xlane.xlu0 %880 }
 0x479   :  { %3418 = vrcp.f32 %v881_v48 }
 0x47c   :  { %v878_v49 = vpop.xlane.xlu0 %877 }
 0x47d   :  { %v887_v50 = vpop.xlane.xlu1 %886  ;;  %3420 = vrcp.f32 %v878_v49 }
 0x47e   :  { %3422 = vrcp.f32 %v887_v50 }
 0x481   :  { %v884_v51 = vpop.xlane.xlu1 %883  ;;  %v893_v52 = vpop.xlane.xlu0 %892 }
 0x482   :  { %3424 = vrcp.f32 %v884_v51 }
 0x483   :  { %3426 = vrcp.f32 %v893_v52 }
 0x485   :  { %v890_v53 = vpop.xlane.xlu0 %889  ;;  %v179_v3 = vpop.permute.xlu1 %178 }
 0x486   :  { %v3419_v54 = vpop.eup %3418  ;;  %3428 = vrcp.f32 %v890_v53  ;;  %v345_v9 = vadd.f32 %v3212_v56, %v179_v3  ;;  %v1496_v3 = vld [vmem:[%s4132_s7 + $0x18] sm:$0xff] }
 0x487   :  { %v909_v55 = vmul.f32 %v3419_v54, %v3732_v11  ;;  %v349_v11 = vpop.f32.mrf.mxu0 }
 0x489   :  { %3237 = vmatpush3.xpose.msk.msra.mxu0 %vm827_vm2, %v909_v55  ;;  %v184_v12 = vpop.permute.xlu1 %183 }
 0x48a   :  { %v3421_v57 = vpop.eup %3420  ;;  %3238 = vmatprep.subr.mxu0 %v3497_v26 }
 0x48b   :  { %v3423_v58 = vpop.eup %3422  ;;  %v908_v59 = vmul.f32 %v3421_v57, %v3736_v13  ;;  %v350_v13 = vadd.f32 %v349_v11, %v184_v12  ;;  %v1493_v57 = vld [vmem:[%s4132_s7] sm:$0xff] }
 0x48c   :  { %v911_v60 = vmul.f32 %v3423_v58, %v3738_v14  ;;  %v1497_v12 = vld [vmem:[%s4132_s7 + $0x20] sm:$0xff] }
 0x48d   :  { %v174_v62 = vpop.permute.xlu0 %173  ;;  %3239 = vmatpush3.xpose.msk.msra.mxu0 %vm827_vm2, %v908_v59  ;;  %v3029_v59 = vld [vmem:[%s4135_s10] ss:$0 sm:$0xff] }
 0x48e   :  { %v340_v63 = vadd.f32 %v339_v61, %v174_v62  ;;  %3244 = vmatpush3.xpose.msk.msra.mxu1 %vm827_vm2, %v911_v60  ;;  %3250 = vmatprep.subr.mxu0 %v3497_v26 }
 0x48f   :  { %v3425_v2 = vpop.eup %3424  ;;  %3245 = vmatprep.subr.mxu1 %v3497_v26 }
 0x490   :  { %v3427_v4 = vpop.eup %3426  ;;  %3241 = vmatmul.mubr.msk.f32.vlgmr.msra.gmra.mxu0 %vm827_vm2, %v340_v63  ;;  %v910_v5 = vmul.f32 %v3425_v2, %v3744_v17 }
 0x491   :  { %v913_v7 = vmul.f32 %v3427_v4, %v3746_v18  ;;  %3254 = vmatprep.mubr.msk.f32.mxu0 %vm3498_vm3, %v3497_v26 }
 0x492   :  { %3246 = vmatpush3.xpose.msk.msra.mxu1 %vm827_vm2, %v910_v5 }
 0x493   :  { %v3429_v8 = vpop.eup %3428  ;;  %3251 = vmatpush3.xpose.msk.msra.mxu0 %vm827_vm2, %v913_v7  ;;  %3257 = vmatprep.subr.mxu1 %v3497_v26 }
 0x494   :  { %3252 = vmatprep.subr.mxu0 %v3497_v26  ;;  %v912_v10 = vmul.f32 %v3429_v8, %v3752_v21  ;;  %v1365_v21 = vld [vmem:[%s4148_s22 + $0x8] sm:$0xff] }
 0x495   :  { %3248 = vmatmul.mubr.msk.f32.vlgmr.msra.gmra.mxu1 %vm827_vm2, %v345_v9 }
 0x496   :  { %3261 = vmatprep.mubr.msk.f32.mxu1 %vm3498_vm3, %v3497_v26 }
 0x497   :  { %3253 = vmatpush3.xpose.msk.msra.mxu0 %vm827_vm2, %v912_v10 }
 0x498   :  { %3264 = vmatprep.subr.mxu0 %v1267_v31 }
 0x49a   :  { %3255 = vmatmul.mubr.msk.f32.vlgmr.msra.gmra.mxu0 %vm827_vm2, %v350_v13  ;;  %v1498_v13 = vld [vmem:[%s4132_s7 + $0x28] sm:$0xff] }
 0x49b   :  { %3265 = vmatpush3.msra.mxu0 %v1267_v31 }
 0x49c   :  { %3266 = vmatprep.subr.mxu0 %v1266_v32 }
 0x49d   :  { %3267 = vmatpush3.msra.mxu0 %v1266_v32 }
 0x49e   :  { %3268 = vmatprep.subr.mxu0 %v1265_v39 }
 0x49f   :  { %3269 = vmatpush3.msra.mxu0 %v1265_v39 }
 0x4a0   :  { %3270 = vmatprep.subr.mxu0 %v1264_v40 }
 0x4a1   :  { %3271 = vmatpush3.msra.mxu0 %v1264_v40 }
 0x4ba   :  { %v899_v14 = vpop.xlane.xlu1 %898 }
 0x4bb   :  { %3430 = vrcp.f32 %v899_v14 }
 0x4be   :  { %v896_v15 = vpop.xlane.xlu1 %895 }
 0x4bf   :  { %3432 = vrcp.f32 %v896_v15  ;;  %v1499_v15 = vld [vmem:[%s4132_s7 + $0x30] sm:$0xff] }
 0x4c2   :  { %v189_v19 = vpop.permute.xlu1 %188 }
 0x4c3   :  { %v355_v23 = vadd.f32 %v3215_v6, %v189_v19 }
 0x4c6   :  { %v1373_v42 = vpop.permute.xlu1 %1372 }
 0x4c8   :  { %v3431_v16 = vpop.eup %3430 }
 0x4c9   :  { %v915_v17 = vmul.f32 %v3431_v16, %v3773_v35  ;;  %v1500_v16 = vld [vmem:[%s4132_s7 + $0x38] sm:$0xff] }
 0x4ca   :  { %v1378_v44 = vpop.permute.xlu1 %1377 }
 0x4cb   :  { %3258 = vmatpush3.xpose.msk.msra.mxu1 %vm827_vm2, %v915_v17 }
 0x4cc   :  { %v3433_v18 = vpop.eup %3432  ;;  %3259 = vmatprep.subr.mxu1 %v3497_v26 }
 0x4cd   :  { %v914_v20 = vmul.f32 %v3433_v18, %v3777_v37 }
 0x4ce   :  { %v1383_v50 = vpop.permute.xlu1 %1382 }
 0x4cf   :  { %3260 = vmatpush3.xpose.msk.msra.mxu1 %vm827_vm2, %v914_v20 }
 0x4d0   :  { %3275 = vmatprep.subr.msk.mxu1 %vm63_vm0, %v1365_v21 }
 0x4d2   :  { %3262 = vmatmul.mubr.msk.f32.vlgmr.msra.gmra.mxu1 %vm827_vm2, %v355_v23  ;;  %v1388_v53 = vpop.permute.xlu1 %1387 }
 0x4d3   :  { %3276 = vmatpush3.xpose.msk.msra.mxu1 %vm63_vm0, %v1365_v21  ;;  %3279 = vmatprep.mubr.msk.f32.mxu1 %vm63_vm0, %v1360_v24 }
 0x4d4   :  { %3277 = vmatprep.subr.msk.mxu1 %vm63_vm0, %v1364_v27 }
 0x4d6   :  { %v1512_v4 = vpop.permute.xlu1 %1511 }
 0x4d7   :  { %3278 = vmatpush3.xpose.msk.msra.mxu1 %vm63_vm0, %v1364_v27 }
 0x4da   :  { %3280 = vmatmul.mubr.msk.f32.vlgmr.msra.gmra.mxu1 %vm63_vm0, %v1361_v28  ;;  %v1517_v5 = vpop.permute.xlu1 %1516 }
 0x4db   :  { %3282 = vmatprep.mubr.msk.f32.mxu1 %vm63_vm0, %v1362_v29 }
 0x4de   :  { %3283 = vmatmul.mubr.msk.f32.gmra.mxu1 %vm63_vm0, %v1363_v30  ;;  %v1522_v6 = vpop.permute.xlu1 %1521 }
 0x4e2   :  { %v1527_v7 = vpop.permute.xlu1 %1526 }
 0x550   :  { %v991_v33 = vpop.f32.mrf.mxu0 }
 0x551   :  { %1232 = vxpose.xlu0.b32.start [1/4] (short) (narrow) %v991_v33, 16 }
 0x552   :  { %v3242_v34 = vpop.f32.mrf.mxu0 }
 0x555   :  { %v1070_v35 = vpop.f32.mrf.mxu1 }
 0x556   :  { %1233 = vxpose.xlu0.b32.cont [2/4] (short) (narrow) %v1070_v35, 16 }
 0x557   :  { %v3249_v36 = vpop.f32.mrf.mxu1 }
 0x55a   :  { %v1149_v37 = vpop.f32.mrf.mxu0 }
 0x55b   :  { %1234 = vxpose.xlu0.b32.cont [3/4] (short) (narrow) %v1149_v37, 16 }
 0x55c   :  { %v3256_v38 = vpop.f32.mrf.mxu0 }
 0x592   :  { %v1228_v41 = vpop.f32.mrf.mxu1 }
 0x593   :  { %1235 = vxpose.xlu0.b32.end [4/4] (short) (narrow) %v1228_v41, 16 }
 0x594   :  { %v3263_v43 = vpop.f32.mrf.mxu1 }
 0x59a   :  { %v3281_v45 = vpop.f32.mrf.mxu1 }
 0x59b   :  { %v1480_v46 = vadd.f32 %v3281_v45, %v1378_v44 }
 0x59c   :  { %v1474_v47 = vpop.f32.mrf.mxu1 }
 0x59d   :  { %v1475_v48 = vadd.f32 %v1474_v47, %v1373_v42  ;;  %1716 = vxpose.xlu0.b32.start.end [1/1] (short) (narrow) %v1480_v46, 16 }
 0x59e   :  { %v3284_v49 = vpop.f32.mrf.mxu1 }
 0x59f   :  { %1684 = vxpose.xlu1.b32.start.end [1/1] (short) (narrow) %v1475_v48, 16  ;;  %v1490_v54 = vadd.f32 %v3284_v49, %v1388_v53 }
 0x5a0   :  { %v1484_v51 = vpop.f32.mrf.mxu1 }
 0x5a1   :  { %v1485_v52 = vadd.f32 %v1484_v51, %v1383_v50 }
 0x5a3   :  { %1748 = vxpose.xlu0.b32.start.end [1/1] (short) (narrow) %v1485_v52, 16 }
 0x5a8   :  { %1780 = vxpose.xlu0.b32.start.end [1/1] (short) (narrow) %v1490_v54, 16 }
 0x603   :  { %v1248_v55 = vpop.trf.xlu0 }
 0x604   :  { %3272 = vmatprep.mubr.msk.f32.mxu0 %vm63_vm0, %v1248_v55 }
 0x607   :  { %v1249_v56 = vpop.trf.xlu0 }
 0x608   :  { %3273 = vmatmul.mubr.msk.f32.vlgmr.msra.gmra.mxu0 %vm63_vm0, %v1249_v56 }
 0x609   :  { %3289 = vmatprep.mubr.msk.f32.mxu0 %vm63_vm0, %v1493_v57 }
 0x619   :  { %v1732_v9 = vpop.trf.xlu0 }
 0x61b   :  { %v1700_v8 = vpop.trf.xlu1 }
 0x61c   :  { %3303 = vmatprep.mubr.msk.f32.mxu1 %vm486_vm1, %v1700_v8 }
 0x61d   :  { %v1733_v10 = vpop.trf.xlu0 }
 0x61f   :  { %v1701_v23 = vpop.trf.xlu1 }
 0x621   :  { %v1764_v11 = vpop.trf.xlu0 }
 0x625   :  { %v1765_v14 = vpop.trf.xlu0 }
 0x629   :  { %v1796_v17 = vpop.trf.xlu0 }
 0x62d   :  { %v1797_v30 = vpop.trf.xlu0 }
 0x6c8   :  { %v3274_v58 = vpop.f32.mrf.mxu0 }
 0x6c9   :  { %v1350_v60 = vadd.f32 %v3274_v58, %v3595_v0  ;;  %v1494_v0 = vld [vmem:[%s4132_s7 + $0x8] sm:$0xff] }
 0x6ca   :  { %v1340_v61 = vpop.f32.mrf.mxu0 }
 0x6cb   :  { %v3886_v62 = vadd.f32 %v3029_v59, %v1350_v60  ;;  %v1349_v63 = vadd.f32 %v1340_v61, %v3600_v1  ;;  %v1495_v1 = vld [vmem:[%s4132_s7 + $0x10] sm:$0xff] }
 0x6cd   :  { %v3889_v2 = vadd.f32 %v3029_v59, %v1349_v63  ;;  %3285 = vmatprep.subr.msk.mxu0 %vm63_vm0, %v3886_v62 }
 0x6ce   :  { %3286 = vmatpush3.xpose.msk.msra.mxu0 %vm63_vm0, %v3886_v62 }
 0x6cf   :  { %3287 = vmatprep.subr.msk.mxu0 %vm63_vm0, %v3889_v2 }
 0x6d2   :  { %3288 = vmatpush3.xpose.msk.msra.mxu0 %vm63_vm0, %v3889_v2 }
 0x6d5   :  { %3290 = vmatmul.mubr.msk.f32.vlgmr.msra.gmra.mxu0 %vm63_vm0, %v1494_v0 }
 0x6d6   :  { %3292 = vmatprep.mubr.msk.f32.mxu0 %vm63_vm0, %v1495_v1 }
 0x6d9   :  { %3293 = vmatmul.mubr.msk.f32.gmra.mxu0 %vm63_vm0, %v1496_v3 }
 0x6da   :  { %3295 = vmatprep.mubr.msk.f32.mxu0 %vm63_vm0, %v1497_v12 }
 0x6dd   :  { %3296 = vmatmul.mubr.msk.f32.gmra.mxu0 %vm63_vm0, %v1498_v13 }
 0x6de   :  { %3298 = vmatprep.mubr.msk.f32.mxu0 %vm63_vm0, %v1499_v15 }
 0x6e1   :  { %3299 = vmatmul.mubr.msk.f32.gmra.mxu0 %vm63_vm0, %v1500_v16 }
 0x6e2   :  { %3318 = vmatprep.mubr.msk.f32.mxu0 %vm486_vm1, %v1796_v17 }
 0x795   :  { %v3291_v18 = vpop.f32.mrf.mxu0 }
 0x796   :  { %v1651_v24 = vadd.f32 %v3291_v18, %v1517_v5  ;;  %v1505_v5 = vld [vmem:[%s4133_s8 + $0x20] sm:$0xff] }
 0x797   :  { %v1645_v19 = vpop.f32.mrf.mxu0 }
 0x798   :  { %v1646_v20 = vadd.f32 %v1645_v19, %v1512_v4 }
 0x799   :  { %v3294_v21 = vpop.f32.mrf.mxu0 }
 0x79a   :  { %v1661_v27 = vadd.f32 %v3294_v21, %v1527_v7  ;;  %3301 = vmatprep.subr.mxu1 %v1646_v20 }
 0x79b   :  { %v1655_v28 = vpop.f32.mrf.mxu0  ;;  %3302 = vmatpush3.msra.mxu1 %v1646_v20 }
 0x79c   :  { %v1656_v29 = vadd.f32 %v1655_v28, %v1522_v6  ;;  %3304 = vmatmul.mubr.msk.f32.vlgmr.msra.gmra.mxu1 %vm486_vm1, %v1701_v23  ;;  %3306 = vmatprep.subr.mxu1 %v1651_v24 }
 0x79d   :  { %3316 = vmatprep.subr.mxu0 %v1661_v27  ;;  %3307 = vmatpush3.msra.mxu1 %v1651_v24  ;;  %v3941_v31 = vpop.f32.mrf.mxu0 }
 0x79e   :  { %3317 = vmatpush3.msra.mxu0 %v1661_v27  ;;  %3311 = vmatprep.subr.mxu1 %v1656_v29 }
 0x79f   :  { %3308 = vmatprep.mubr.msk.f32.mxu1 %vm486_vm1, %v1732_v9  ;;  %3319 = vmatmul.mubr.msk.f32.vlgmr.msra.gmra.mxu0 %vm486_vm1, %v1797_v30  ;;  %v3943_v32 = vpop.f32.mrf.mxu0 }
 0x7a0   :  { %3309 = vmatmul.mubr.msk.f32.vlgmr.msra.gmra.mxu1 %vm486_vm1, %v1733_v10  ;;  %3328 = vmatprep.subr.mxu0 %v3497_v26 }
 0x7a1   :  { %3312 = vmatpush3.msra.mxu1 %v1656_v29  ;;  %3313 = vmatprep.mubr.msk.f32.mxu1 %vm486_vm1, %v1764_v11  ;;  %v3945_v34 = vpop.f32.mrf.mxu0 }
 0x7a2   :  { %3321 = vmatprep.subr.mxu1 %v3497_v26  ;;  %3332 = vmatprep.mubr.msk.f32.mxu0 %vm3498_vm3, %v3497_v26 }
 0x7a3   :  { %v3948_v40 = vpop.f32.mrf.mxu0 }
 0x7a4   :  { %3314 = vmatmul.mubr.msk.f32.vlgmr.msra.gmra.mxu1 %vm486_vm1, %v1765_v14 }
 0x7a5   :  { %3325 = vmatprep.mubr.msk.f32.mxu1 %vm3498_vm3, %v3497_v26 }
 0x85c   :  { %v3305_v33 = vpop.f32.mrf.mxu1 }
 0x85d   :  { %v2137_v35 = vmul.f32 0.35355338, %v3305_v33 }
 0x85e   :  { %v1884_v36 = vpop.f32.mrf.mxu1 }
 0x85f   :  { %v2136_v37 = vmul.f32 0.35355338, %v1884_v36  ;;  %v2145_v38 = vadd.f32 %v2137_v35, %v3703_v22  ;;  %v3320_v48 = vpop.f32.mrf.mxu0  ;;  %v1507_v36 = vld [vmem:[%s4133_s8 + $0x30] sm:$0xff] }
 0x860   :  { %v3310_v39 = vpop.f32.mrf.mxu1  ;;  %v2143_v56 = vmul.f32 0.35355338, %v3320_v48  ;;  %v1506_v48 = vld [vmem:[%s4133_s8 + $0x28] sm:$0xff] }
 0x861   :  { %v2139_v41 = vmul.f32 0.35355338, %v3310_v39  ;;  %v2155_v42 = vsel %vm827_vm2, %v2145_v38, -inf  ;;  %v2144_v43 = vadd.f32 %v2136_v37, %v3708_v25  ;;  %v2127_v58 = vpop.f32.mrf.mxu0 }
 0x862   :  { %2156 = vmax.xlane.f32.xlu0 %v2155_v42  ;;  %v1965_v44 = vpop.f32.mrf.mxu1  ;;  %v2142_v63 = vmul.f32 0.35355338, %v2127_v58  ;;  %v2151_v0 = vadd.f32 %v2143_v56, %v3703_v22 }
 0x863   :  { %v2138_v45 = vmul.f32 0.35355338, %v1965_v44  ;;  %v2147_v46 = vadd.f32 %v2139_v41, %v3703_v22  ;;  %v2152_v50 = vsel %vm827_vm2, %v2144_v43, -inf }
 0x864   :  { %v3315_v47 = vpop.f32.mrf.mxu1  ;;  %v2173_v1 = vsel %vm827_vm2, %v2151_v0, -inf  ;;  %v2150_v3 = vadd.f32 %v2142_v63, %v3708_v25 }
 0x865   :  { %v2141_v49 = vmul.f32 0.35355338, %v3315_v47  ;;  %v2161_v51 = vsel %vm827_vm2, %v2147_v46, -inf  ;;  %v2146_v52 = vadd.f32 %v2138_v45, %v3708_v25 }
 0x866   :  { %2153 = vmax.xlane.f32.xlu0 %v2152_v50  ;;  %2162 = vmax.xlane.f32.xlu1 %v2161_v51  ;;  %v2046_v53 = vpop.f32.mrf.mxu1  ;;  %v2170_v4 = vsel %vm827_vm2, %v2150_v3, -inf }
 0x867   :  { %v2140_v54 = vmul.f32 0.35355338, %v2046_v53  ;;  %v2158_v55 = vsel %vm827_vm2, %v2146_v52, -inf  ;;  %v3958_v57 = vadd.f32 %v2141_v49, %v3703_v22  ;;  %v1508_v53 = vld [vmem:[%s4133_s8 + $0x38] sm:$0xff] }
 0x869   :  { %v3961_v59 = vadd.f32 %v2140_v54, %v3708_v25  ;;  %v2167_v61 = vsel %vm827_vm2, %v3958_v57, -inf }
 0x86a   :  { %2159 = vmax.xlane.f32.xlu0 %v2158_v55 }
 0x86b   :  { %v2164_v60 = vsel %vm827_vm2, %v3961_v59, -inf }
 0x86c   :  { %2165 = vmax.xlane.f32.xlu1 %v2164_v60 }
 0x86e   :  { %2168 = vmax.xlane.f32.xlu0 %v2167_v61 }
 0x872   :  { %2174 = vmax.xlane.f32.xlu0 %v2173_v1 }
 0x876   :  { %2171 = vmax.xlane.f32.xlu0 %v2170_v4 }
 0x87d   :  { %1531 = vperm.xlu1 %3397, %v1505_v5  }
 0x8eb   :  { %v2157_v6 = vpop.xlane.xlu0 %2156 }
 0x8ec   :  { %v2177_v7 = vsub.f32 %v2145_v38, %v2157_v6 }
 0x8ee   :  { %v2186_v8 = vmul.f32 1.442695, %v2177_v7 }
 0x8ef   :  { %v2154_v9 = vpop.xlane.xlu0 %2153  ;;  %v2163_v12 = vpop.xlane.xlu1 %2162 }
 0x8f0   :  { %3434 = vpow2.f32 %v2186_v8  ;;  %v2176_v22 = vsub.f32 %v2144_v43, %v2154_v9  ;;  %v2179_v13 = vsub.f32 %v2147_v46, %v2163_v12 }
 0x8f2   :  { %v2184_v10 = vmul.f32 1.442695, %v2176_v22  ;;  %v2190_v17 = vmul.f32 1.442695, %v2179_v13 }
 0x8f3   :  { %v2160_v11 = vpop.xlane.xlu0 %2159 }
 0x8f4   :  { %3436 = vpow2.f32 %v2184_v10  ;;  %v2178_v24 = vsub.f32 %v2146_v52, %v2160_v11 }
 0x8f5   :  { %v2166_v44 = vpop.xlane.xlu1 %2165 }
 0x8f6   :  { %v2188_v29 = vmul.f32 1.442695, %v2178_v24  ;;  %v2180_v45 = vsub.f32 %v3961_v59, %v2166_v44 }
 0x8f7   :  { %v2169_v25 = vpop.xlane.xlu0 %2168 }
 0x8f8   :  { %v2181_v43 = vsub.f32 %v3958_v57, %v2169_v25  ;;  %v2192_v47 = vmul.f32 1.442695, %v2180_v45 }
 0x8f9   :  { %v1532_v54 = vpop.permute.xlu1 %1531 }
 0x8fa   :  { %v2194_v46 = vmul.f32 1.442695, %v2181_v43 }
 0x8fb   :  { %v2175_v14 = vpop.xlane.xlu0 %2174 }
 0x8fc   :  { %v2183_v15 = vsub.f32 %v2151_v0, %v2175_v14  ;;  %v1666_v0 = vadd.f32 %v3943_v32, %v1532_v54 }
 0x8fd   :  { %v3435_v16 = vpop.eup %3434 }
 0x8fe   :  { %v2198_v18 = vmul.f32 1.442695, %v2183_v15  ;;  %v2203_v19 = vsel %vm827_vm2, %v3435_v16, 0.0 }
 0x8ff   :  { %v2172_v20 = vpop.xlane.xlu0 %2171  ;;  %2204 = vadd.xlane.f32.xlu1 %v2203_v19 }
 0x900   :  { %3438 = vpow2.f32 %v2198_v18  ;;  %v2182_v21 = vsub.f32 %v2150_v3, %v2172_v20  ;;  %v3068_v20 = vld [vmem:[%s4134_s9 + $0x30] sm:$0xff] }
 0x901   :  { %v3437_v23 = vpop.eup %3436  ;;  %3440 = vpow2.f32 %v2190_v17 }
 0x902   :  { %v2196_v27 = vmul.f32 1.442695, %v2182_v21  ;;  %v2200_v28 = vsel %vm827_vm2, %v3437_v23, 0.0 }
 0x903   :  { %2201 = vadd.xlane.f32.xlu1 %v2200_v28  ;;  %v3067_v28 = vld [vmem:[%s4134_s9 + $0x28] sm:$0xff] }
 0x904   :  { %3442 = vpow2.f32 %v2196_v27 }
 0x905   :  { %3444 = vpow2.f32 %v2188_v29  ;;  %v3066_v29 = vld [vmem:[%s4134_s9 + $0x20] sm:$0xff] }
 0x906   :  { %3446 = vpow2.f32 %v2194_v46 }
 0x907   :  { %3448 = vpow2.f32 %v2192_v47 }
 0x90d   :  { %v3976_v30 = vpop.eup %3438 }
 0x90e   :  { %v2221_v33 = vsel %vm827_vm2, %v3976_v30, 0.0  ;;  %v3441_v35 = vpop.eup %3440 }
 0x90f   :  { %2222 = vadd.xlane.f32.xlu0 %v2221_v33  ;;  %v2209_v37 = vsel %vm827_vm2, %v3441_v35, 0.0 }
 0x911   :  { %v3984_v38 = vpop.eup %3442 }
 0x912   :  { %v2218_v39 = vsel %vm827_vm2, %v3984_v38, 0.0  ;;  %v3445_v41 = vpop.eup %3444 }
 0x913   :  { %2210 = vadd.xlane.f32.xlu0 %v2209_v37  ;;  %v2206_v42 = vsel %vm827_vm2, %v3445_v41, 0.0  ;;  %v3447_v49 = vpop.eup %3446 }
 0x914   :  { %1541 = vperm.xlu1 %3397, %v1507_v36   ;;  %v2215_v50 = vsel %vm827_vm2, %v3447_v49, 0.0  ;;  %v3449_v51 = vpop.eup %3448 }
 0x915   :  { %v2212_v52 = vsel %vm827_vm2, %v3449_v51, 0.0 }
 0x917   :  { %2219 = vadd.xlane.f32.xlu0 %v2218_v39 }
 0x91b   :  { %2207 = vadd.xlane.f32.xlu0 %v2206_v42  ;;  %v3073_v42 = vld [vmem:[%s4135_s10 + $0x1] ss:$0 sm:$0xff] }
 0x931   :  { %1536 = vperm.xlu0 %3396, %v1506_v48  }
 0x938   :  { %2216 = vadd.xlane.f32.xlu1 %v2215_v50 }
 0x93c   :  { %2213 = vadd.xlane.f32.xlu1 %v2212_v52 }
 0x94d   :  { %1546 = vperm.xlu1 %3397, %v1508_v53  }
 0x988   :  { %v2205_v55 = vpop.xlane.xlu1 %2204 }
 0x989   :  { %3450 = vrcp.f32 %v2205_v55 }
 0x98c   :  { %v2202_v56 = vpop.xlane.xlu1 %2201 }
 0x98d   :  { %3452 = vrcp.f32 %v2202_v56 }
 0x990   :  { %v1542_v12 = vpop.permute.xlu1 %1541 }
 0x991   :  { %v1676_v19 = vadd.f32 %v3948_v40, %v1542_v12 }
 0x996   :  { %v3451_v57 = vpop.eup %3450 }
 0x997   :  { %v2233_v58 = vmul.f32 %v3451_v57, %v3435_v16 }
 0x998   :  { %v2223_v59 = vpop.xlane.xlu0 %2222 }
 0x999   :  { %3322 = vmatpush3.xpose.msk.msra.mxu1 %vm827_vm2, %v2233_v58 }
 0x99a   :  { %v3453_v60 = vpop.eup %3452  ;;  %3323 = vmatprep.subr.mxu1 %v3497_v26 }
 0x99b   :  { %v2232_v61 = vmul.f32 %v3453_v60, %v3437_v23 }
 0x99c   :  { %v2211_v63 = vpop.xlane.xlu0 %2210 }
 0x99d   :  { %3454 = vrcp.f32 %v2211_v63  ;;  %3324 = vmatpush3.xpose.msk.msra.mxu1 %vm827_vm2, %v2232_v61  ;;  %v3076_v63 = vld [vmem:[%s4136_s11 + $0x1] ss:$0 sm:$0xff] }
 0x99e   :  { %3335 = vmatprep.subr.mxu1 %v3497_v26 }
 0x9a0   :  { %v2220_v1 = vpop.xlane.xlu0 %2219  ;;  %3326 = vmatmul.mubr.msk.f32.vlgmr.msra.gmra.mxu1 %vm827_vm2, %v1666_v0 }
 0x9a1   :  { %3339 = vmatprep.mubr.msk.f32.mxu1 %vm3498_vm3, %v3497_v26 }
 0x9a4   :  { %v2208_v3 = vpop.xlane.xlu0 %2207 }
 0x9a5   :  { %3456 = vrcp.f32 %v2208_v3 }
 0x9a6   :  { %3458 = vrcp.f32 %v2223_v59 }
 0x9a7   :  { %3460 = vrcp.f32 %v2220_v1  ;;  %v3077_v1 = vld [vmem:[%s4137_s12 + $0x1] ss:$0 sm:$0xff] }
 0x9aa   :  { %v3455_v4 = vpop.eup %3454 }
 0x9ab   :  { %v2235_v5 = vmul.f32 %v3455_v4, %v3441_v35 }
 0x9ac   :  { %v1537_v32 = vpop.permute.xlu0 %1536 }
 0x9ad   :  { %3329 = vmatpush3.xpose.msk.msra.mxu0 %vm827_vm2, %v2235_v5  ;;  %v1671_v9 = vadd.f32 %v3941_v31, %v1537_v32 }
 0x9ae   :  { %3330 = vmatprep.subr.mxu0 %v3497_v26 }
 0x9b2   :  { %v3457_v6 = vpop.eup %3456 }
 0x9b3   :  { %v2234_v7 = vmul.f32 %v3457_v6, %v3445_v41  ;;  %v3459_v8 = vpop.eup %3458 }
 0x9b4   :  { %v2239_v22 = vmul.f32 %v3459_v8, %v3976_v30  ;;  %v3461_v10 = vpop.eup %3460 }
 0x9b5   :  { %3331 = vmatpush3.xpose.msk.msra.mxu0 %vm827_vm2, %v2234_v7  ;;  %v2238_v11 = vmul.f32 %v3461_v10, %v3984_v38 }
 0x9b6   :  { %3342 = vmatprep.subr.mxu0 %v3497_v26 }
 0x9b8   :  { %3333 = vmatmul.mubr.msk.f32.vlgmr.msra.gmra.mxu0 %vm827_vm2, %v1671_v9 }
 0x9b9   :  { %3343 = vmatpush3.xpose.msk.msra.mxu0 %vm827_vm2, %v2239_v22  ;;  %3346 = vmatprep.mubr.msk.f32.mxu0 %vm3498_vm3, %v3497_v26 }
 0x9ba   :  { %3344 = vmatprep.subr.mxu0 %v3497_v26 }
 0x9bd   :  { %3345 = vmatpush3.xpose.msk.msra.mxu0 %vm827_vm2, %v2238_v11 }
 0x9c1   :  { %v2217_v31 = vpop.xlane.xlu1 %2216 }
 0x9c2   :  { %3462 = vrcp.f32 %v2217_v31 }
 0x9c5   :  { %v2214_v25 = vpop.xlane.xlu1 %2213 }
 0x9c6   :  { %3464 = vrcp.f32 %v2214_v25 }
 0x9c9   :  { %v1547_v13 = vpop.permute.xlu1 %1546 }
 0x9ca   :  { %v1681_v14 = vadd.f32 %v3945_v34, %v1547_v13  ;;  %v3069_v34 = vld [vmem:[%s4134_s9 + $0x38] sm:$0xff] }
 0x9cc   :  { %3347 = vmatmul.mubr.msk.f32.vlgmr.msra.gmra.mxu0 %vm827_vm2, %v1681_v14 }
 0x9cf   :  { %v3463_v15 = vpop.eup %3462 }
 0x9d0   :  { %v2237_v16 = vmul.f32 %v3463_v15, %v3447_v49 }
 0x9d2   :  { %3336 = vmatpush3.xpose.msk.msra.mxu1 %vm827_vm2, %v2237_v16 }
 0x9d3   :  { %v3465_v17 = vpop.eup %3464  ;;  %3337 = vmatprep.subr.mxu1 %v3497_v26 }
 0x9d4   :  { %v2236_v18 = vmul.f32 %v3465_v17, %v3449_v51  ;;  %v2781_v17 = vld [vmem:[%s4138_s13 + $0x18] sm:$0xff] }
 0x9d5   :  { %3360 = vmatprep.subr.mxu0 %v2781_v17 }
 0x9d6   :  { %3338 = vmatpush3.xpose.msk.msra.mxu1 %vm827_vm2, %v2236_v18  ;;  %v2780_v18 = vld [vmem:[%s4138_s13 + $0x10] sm:$0xff]  ;;  %3361 = vmatpush3.msra.mxu0 %v2781_v17 }
 0x9d7   :  { %3349 = vmatprep.subr.mxu1 %v3069_v34  ;;  %3362 = vmatprep.subr.mxu0 %v2780_v18 }
 0x9d8   :  { %3363 = vmatpush3.msra.mxu0 %v2780_v18 }
 0x9d9   :  { %3340 = vmatmul.mubr.msk.f32.vlgmr.msra.gmra.mxu1 %vm827_vm2, %v1676_v19  ;;  %v2779_v19 = vld [vmem:[%s4138_s13 + $0x8] sm:$0xff] }
 0x9da   :  { %3350 = vmatpush3.msra.mxu1 %v3069_v34  ;;  %3364 = vmatprep.subr.mxu0 %v2779_v19  ;;  %v2778_v34 = vld [vmem:[%s4138_s13] sm:$0xff] }
 0x9db   :  { %3351 = vmatprep.subr.mxu1 %v3068_v20  ;;  %3365 = vmatpush3.msra.mxu0 %v2779_v19 }
 0x9dc   :  { %3352 = vmatpush3.msra.mxu1 %v3068_v20  ;;  %3366 = vmatprep.subr.mxu0 %v2778_v34  ;;  %v2879_v20 = vld [vmem:[%s4140_s15 + $0x38] sm:$0xff] }
 0x9dd   :  { %3353 = vmatprep.subr.mxu1 %v3067_v28  ;;  %3367 = vmatpush3.msra.mxu0 %v2778_v34 }
 0x9de   :  { %3354 = vmatpush3.msra.mxu1 %v3067_v28 }
 0x9df   :  { %3355 = vmatprep.subr.mxu1 %v3066_v29 }
 0x9e0   :  { %3356 = vmatpush3.msra.mxu1 %v3066_v29 }
 0x9e1   :  { %3371 = vmatprep.subr.mxu1 %v2879_v20 }
 0xa60   :  { %v2315_v26 = vpop.f32.mrf.mxu1 }
 0xa61   :  { %2556 = vxpose.xlu0.b32.start [1/4] (short) (narrow) %v2315_v26, 16  ;;  %v2878_v26 = vld [vmem:[%s4140_s15 + $0x30] sm:$0xff] }
 0xa62   :  { %v3327_v21 = vpop.f32.mrf.mxu1 }
 0xa63   :  { %v2877_v21 = vld [vmem:[%s4140_s15 + $0x28] sm:$0xff] }
 0xa78   :  { %v2394_v23 = vpop.f32.mrf.mxu0 }
 0xa79   :  { %2557 = vxpose.xlu0.b32.cont [2/4] (short) (narrow) %v2394_v23, 16  ;;  %v2876_v23 = vld [vmem:[%s4140_s15 + $0x20] sm:$0xff] }
 0xa7a   :  { %v3334_v40 = vpop.f32.mrf.mxu0 }
 0xa8c   :  { %v2552_v24 = vpop.f32.mrf.mxu0 }
 0xa8e   :  { %v3348_v27 = vpop.f32.mrf.mxu0 }
 0xa99   :  { %v2473_v30 = vpop.f32.mrf.mxu1 }
 0xa9a   :  { %2558 = vxpose.xlu0.b32.cont [3/4] (short) (narrow) %v2473_v30, 16 }
 0xa9b   :  { %v3341_v33 = vpop.f32.mrf.mxu1 }
 0xa9e   :  { %2559 = vxpose.xlu0.b32.end [4/4] (short) (narrow) %v2552_v24, 16 }
 0xb0e   :  { %v2572_v35 = vpop.trf.xlu0 }
 0xb0f   :  { %3357 = vmatprep.mubr.msk.f32.mxu1 %vm63_vm0, %v2572_v35  ;;  %v3080_v35 = vld [vmem:[%s4136_s11 + $0x2] ss:$0 sm:$0xff] }
 0xb12   :  { %v2573_v36 = vpop.trf.xlu0 }
 0xb13   :  { %3358 = vmatmul.mubr.msk.f32.vlgmr.msra.gmra.mxu1 %vm63_vm0, %v2573_v36 }
 0xb14   :  { %3372 = vmatpush3.msra.mxu1 %v2879_v20 }
 0xb15   :  { %3373 = vmatprep.subr.mxu1 %v2878_v26 }
 0xb16   :  { %3374 = vmatpush3.msra.mxu1 %v2878_v26 }
 0xb17   :  { %3375 = vmatprep.subr.mxu1 %v2877_v21 }
 0xb18   :  { %3376 = vmatpush3.msra.mxu1 %v2877_v21 }
 0xb19   :  { %3377 = vmatprep.subr.mxu1 %v2876_v23 }
 0xb1a   :  { %3378 = vmatpush3.msra.mxu1 %v2876_v23 }
 0xbd3   :  { %v3359_v37 = vpop.f32.mrf.mxu1 }
 0xbd4   :  { %v2675_v39 = vadd.f32 %v3359_v37, %v3886_v62  ;;  %v3081_v37 = vld [vmem:[%s4137_s12 + $0x2] ss:$0 sm:$0xff] }
 0xbd5   :  { %v2665_v38 = vpop.f32.mrf.mxu1 }
 0xbd6   :  { %v2674_v41 = vadd.f32 %v2665_v38, %v3889_v2  ;;  %v2685_v45 = vadd.f32 %v3073_v42, %v2675_v39 }
 0xbd8   :  { %v2684_v43 = vadd.f32 %v3073_v42, %v2674_v41  ;;  %v2693_v46 = vsel %vm63_vm0, %v2685_v45, 0.0 }
 0xbda   :  { %v2690_v44 = vsel %vm63_vm0, %v2684_v43, 0.0 }
 0xbdb   :  { %2691 = vadd.xlane.f32.xlu1 %v2690_v44 }
 0xbdf   :  { %2694 = vadd.xlane.f32.xlu1 %v2693_v46  ;;  %v2874_v46 = vld [vmem:[%s4140_s15 + $0x10] sm:$0xff] }
 0xc64   :  { %v2692_v47 = vpop.xlane.xlu1 %2691 }
 0xc65   :  { %v2696_v48 = vmul.f32 0.03125, %v2692_v47  ;;  %v2873_v47 = vld [vmem:[%s4140_s15 + $0x8] sm:$0xff] }
 0xc67   :  { %v2698_v49 = vsub.f32 %v2684_v43, %v2696_v48  ;;  %v2872_v48 = vld [vmem:[%s4140_s15] sm:$0xff] }
 0xc68   :  { %v2695_v50 = vpop.xlane.xlu1 %2694 }
 0xc69   :  { %v2697_v51 = vmul.f32 0.03125, %v2695_v50  ;;  %v2700_v62 = vmul.f32 %v2698_v49, %v2698_v49 }
 0xc6b   :  { %v2699_v52 = vsub.f32 %v2685_v45, %v2697_v51  ;;  %v2702_v2 = vsel %vm63_vm0, %v2700_v62, 0.0  ;;  %v2875_v45 = vld [vmem:[%s4140_s15 + $0x18] sm:$0xff]  ;;  %s3499_s15 = smov [#allocation2]  }
 0xc6c   :  { %2703 = vadd.xlane.f32.xlu1 %v2702_v2  ;;  %3379 = vmatprep.subr.mxu1 %v2875_v45  ;;  %s2980_s21 = sshll.u32 %s3499_s15, 4  ;;  %s2981_s21 = int_to_ptr.vmem [resolvable:$true] %s2980_s21 }
 0xc6d   :  { %v2701_v53 = vmul.f32 %v2699_v52, %v2699_v52  ;;  %3380 = vmatpush3.msra.mxu1 %v2875_v45  ;;  %p3479_p1 = scmp.lt.s32.totalorder %s2981_s21, %s2981_s21 }
 0xc6e   :  { %3381 = vmatprep.subr.mxu1 %v2874_v46 }
 0xc6f   :  { %v2705_v54 = vsel %vm63_vm0, %v2701_v53, 0.0  ;;  %3382 = vmatpush3.msra.mxu1 %v2874_v46 }
 0xc70   :  { %2706 = vadd.xlane.f32.xlu0 %v2705_v54  ;;  %3383 = vmatprep.subr.mxu1 %v2873_v47 }
 0xc71   :  { %3384 = vmatpush3.msra.mxu1 %v2873_v47 }
 0xc72   :  { %3385 = vmatprep.subr.mxu1 %v2872_v48 }
 0xc73   :  { %3386 = vmatpush3.msra.mxu1 %v2872_v48 }
 0xcf5   :  { %v2704_v55 = vpop.xlane.xlu1 %2703 }
 0xcf6   :  { %v2708_v56 = vmul.f32 0.03125, %v2704_v55  ;;  %v3087_v55 = vld [vmem:[%s4141_s16] ss:$0 sm:$0xff] }
 0xcf8   :  { %v2710_v57 = vadd.f32 1e-05, %v2708_v56 }
 0xcf9   :  { %v2707_v58 = vpop.xlane.xlu0 %2706 }
 0xcfa   :  { %3466 = vrsqrt.f32 %v2710_v57  ;;  %v2709_v59 = vmul.f32 0.03125, %v2707_v58 }
 0xcfc   :  { %v2711_v60 = vadd.f32 1e-05, %v2709_v59 }
 0xcfe   :  { %3468 = vrsqrt.f32 %v2711_v60 }
 0xd07   :  { %v3467_v61 = vpop.eup %3466 }
 0xd08   :  { %v2714_v0 = vmul.f32 %v3467_v61, %v2698_v49  ;;  %v3082_v49 = vld [vmem:[%s4139_s14] ss:$0 sm:$0xff]  ;;  %s3474_s14 = scalar_lea.vmem %s2981_s21, 256 }
 0xd09   :  { %p3475_p0 = scmp.ne.s32.totalorder %s2981_s21, %s3474_s14  ;;  %p3480_p2 = scmp.lt.s32.totalorder %s3474_s14, %s3474_s14 }
 0xd0a   :  { %v2722_v3 = vmul.f32 %v3076_v63, %v2714_v0 }
 0xd0b   :  { %v3469_v4 = vpop.eup %3468  ;;  %p3481_p3 = por %p3480_p2, %p3479_p1 }
 0xd0c   :  { %v4056_v5 = vadd.f32 %v3077_v1, %v2722_v3  ;;  %v2715_v6 = vmul.f32 %v3469_v4, %v2699_v52 }
 0xd0d   :  { %p3482_p4 = pnand %p3481_p3, %p3475_p0 }
 0xd0e   :  { %v2736_v32 = vsel %vm63_vm0, %v4056_v5, 0.0  ;;  %v2723_v7 = vmul.f32 %v3076_v63, %v2715_v6 }
 0xd0f   :  { %2737 = vadd.xlane.f32.xlu1 %v2736_v32 }
 0xd10   :  { %v4060_v8 = vadd.f32 %v3077_v1, %v2723_v7 }
 0xd12   :  { %v2739_v9 = vsel %vm63_vm0, %v4060_v8, 0.0 }
 0xd13   :  { %2740 = vadd.xlane.f32.xlu1 %v2739_v9 }
 0xd98   :  { %v2738_v22 = vpop.xlane.xlu1 %2737 }
 0xd99   :  { %v2742_v10 = vmul.f32 0.03125, %v2738_v22 }
 0xd9b   :  { %v2744_v11 = vsub.f32 %v4056_v5, %v2742_v10 }
 0xd9c   :  { %v2741_v12 = vpop.xlane.xlu1 %2740 }
 0xd9d   :  { %v2743_v31 = vmul.f32 0.03125, %v2741_v12  ;;  %v2746_v25 = vmul.f32 %v2744_v11, %v2744_v11 }
 0xd9f   :  { %v2745_v13 = vsub.f32 %v4060_v8, %v2743_v31  ;;  %v2748_v14 = vsel %vm63_vm0, %v2746_v25, 0.0 }
 0xda0   :  { %2749 = vadd.xlane.f32.xlu1 %v2748_v14 }
 0xda1   :  { %v2747_v15 = vmul.f32 %v2745_v13, %v2745_v13 }
 0xda3   :  { %v2751_v16 = vsel %vm63_vm0, %v2747_v15, 0.0 }
 0xda4   :  { %2752 = vadd.xlane.f32.xlu1 %v2751_v16 }
 0xe29   :  { %v2750_v40 = vpop.xlane.xlu1 %2749 }
 0xe2a   :  { %v2754_v24 = vmul.f32 0.03125, %v2750_v40 }
 0xe2c   :  { %v2756_v27 = vadd.f32 1e-05, %v2754_v24 }
 0xe2d   :  { %v2753_v28 = vpop.xlane.xlu1 %2752 }
 0xe2e   :  { %3470 = vrsqrt.f32 %v2756_v27  ;;  %v2755_v29 = vmul.f32 0.03125, %v2753_v28 }
 0xe30   :  { %v2757_v30 = vadd.f32 1e-05, %v2755_v29 }
 0xe32   :  { %3472 = vrsqrt.f32 %v2757_v30 }
 0xe3b   :  { %v3471_v33 = vpop.eup %3470 }
 0xe3c   :  { %v2760_v36 = vmul.f32 %v3471_v33, %v2744_v11 }
 0xe3e   :  { %v2768_v38 = vmul.f32 %v3080_v35, %v2760_v36 }
 0xe3f   :  { %v3473_v39 = vpop.eup %3472 }
 0xe40   :  { %v2761_v41 = vmul.f32 %v3473_v39, %v2745_v13  ;;  %v2776_v42 = vadd.f32 %v3081_v37, %v2768_v38 }
 0xe42   :  { %v2769_v43 = vmul.f32 %v3080_v35, %v2761_v41  ;;  %3368 = vmatprep.mubr.msk.f32.mxu0 %vm63_vm0, %v2776_v42 }
 0xe44   :  { %v2777_v44 = vadd.f32 %v3081_v37, %v2769_v43 }
 0xe46   :  { %3369 = vmatmul.mubr.msk.f32.vlgmr.msra.gmra.mxu0 %vm63_vm0, %v2777_v44 }
 0xf06   :  { %v3370_v50 = vpop.f32.mrf.mxu0 }
 0xf07   :  { %v2867_v51 = vadd.f32 %v3370_v50, %v3082_v49 }
 0xf08   :  { %v2861_v62 = vpop.f32.mrf.mxu0 }
 0xf09   :  { %v2862_v52 = vadd.f32 %v3082_v49, %v2861_v62  ;;  %v2871_v53 = vmax.f32 %v2867_v51, 0.0 }
 0xf0b   :  { %v2870_v2 = vmax.f32 %v2862_v52, 0.0 }
 0xf0d   :  { %3387 = vmatprep.mubr.msk.f32.mxu1 %vm2880_vm4, %v2870_v2 }
 0xf0e   :  { %3388 = vmatmul.mubr.msk.f32.vlgmr.msra.gmra.mxu1 %vm2880_vm4, %v2871_v53 }
 0xfce   :  { %v3389_v54 = vpop.f32.mrf.mxu1 }
 0xfcf   :  { %v2963_v56 = vadd.f32 %v3389_v54, %v4060_v8 }
 0xfd0   :  { %v2953_v57 = vpop.f32.mrf.mxu1 }
 0xfd1   :  { %v2972_v58 = vadd.f32 %v3087_v55, %v2963_v56  ;;  %v2962_v59 = vadd.f32 %v2953_v57, %v4056_v5 }
 0xfd3   :  { %2974 = vst.msk [vmem:[#allocation2 + $0x8] sm:$0xff] %vm63_vm0, %v2972_v58  ;;  %v2971_v60 = vadd.f32 %v3087_v55, %v2962_v59 }
 0xfd5   :  { %2973 = vst.msk [vmem:[#allocation2] sm:$0xff] %vm63_vm0, %v2971_v60 }
 0xfd6   :  { %3485 = shalt.err (!%p3482_p4)
}
 0xfd7   :  { %s3500_s16 = smov 128   ;;  %s3501_s22 = smov 8  }
 0xfd8   :  { %2986 = dma.vmem_to_hbm [thread:$0]  %s2981_s21, 256, %s4142_s17, [#allocation3], %s3500_s16, %s3500_s16, %s3501_s22  }
 0xfd9   :  { %3494 = dma.done.wait [#allocation3], 256  }
 0xfda   :  { %3495 = vsyncadd [#allocation3], 4294967040 }
 0xfdb   :  { %2990 = vsyncpa [#allocation3], 1 }

</bundles_post_ra>
